<compile_context>
chip_gen: v7x
topology: tpu7x:2x2x1
jax: 0.10.0
libtpu: 0.0.40
codegen_flags: <defaults>
</compile_context>

<pallas_src>
import functools

import jax
import jax.numpy as jnp
from jax import lax
from jax.experimental import pallas as pl
from jax.experimental.pallas import tpu as pltpu

HIDDEN = 64
PACK = 4                 # batch sub-chunks stacked on the feature axis (fills 256x256 MXU)
LANE = 128
GRANULE = PACK * LANE    # batch tile must be a multiple of this (lane-dense packed chunks)


def _round_up(x, m):
    return ((x + m - 1) // m) * m


def _cdiv(a, b):
    return (a + b - 1) // b


def _pick_tile_b(batch, cap=2048):
    """Multiple of GRANULE, <= cap, and >=2 grid steps when the batch allows (v7x)."""
    n_gran = _round_up(batch, GRANULE) // GRANULE
    if n_gran >= 2:
        tile_gran = max(1, min(cap // GRANULE, (n_gran + 1) // 2))
    else:
        tile_gran = 1
    return tile_gran * GRANULE


# ---------------------------------------------------------------------------
# Weight preparation (hoist out of the hot path when weights are reused).
# ---------------------------------------------------------------------------
def prepare_last_layer_params(mlp_params, theta_w, theta_b):
    """Fuse layer5+theta and expand all weights to the PACK-way block-diag layout."""
    bf16 = jnp.bfloat16
    f32 = jnp.float32
    (w1, b1), (w2, b2), (w3, b3), (w4, b4), (w5, b5) = mlp_params

    # Algebraic fusion of the last MLP layer with the theta linear (no ReLU between).
    w_fused = theta_w @ w5                     # (out_dim, HIDDEN)
    b_fused = theta_w @ b5 + theta_b           # (out_dim,)

    eye = jnp.eye(PACK, dtype=f32)

    def pack_w(w):                             # (o, i) -> block-diag (PACK*o, PACK*i)
        return jnp.kron(eye, w.astype(f32))

    def pack_b(b):                             # (o,) -> (PACK*o, 1)
        return jnp.tile(b.astype(f32), PACK).reshape(-1, 1)

    return dict(
        w1=pack_w(w1).astype(bf16),                                   # (256, PACK*in)
        b1=pack_b(b1),                                                # (256, 1)
        wmid=jnp.stack([pack_w(w) for w in (w2, w3, w4)]).astype(bf16),  # (3,256,256)
        bmid=jnp.stack([pack_b(b) for b in (b2, b3, b4)]),            # (3,256,1)
        wf=pack_w(w_fused).astype(bf16),                              # (PACK*out, 256)
        bf=pack_b(b_fused),                                           # (PACK*out, 1)
    )


# ---------------------------------------------------------------------------
# Kernel
# ---------------------------------------------------------------------------
def _make_kernel(input_dim, tile_b, batch):
    q = tile_b // PACK
    ragged = (batch % tile_b) != 0   # static: masking only compiled in when needed

    def kernel(x_ref, w1_ref, b1_ref, wmid_ref, bmid_ref, wf_ref, bf_ref, o_ref):
        xt = x_ref[...]                                   # (input_dim, tile_b) bf16
        if ragged:
            # Zero the out-of-bounds batch columns of the (possibly ragged) block.
            # Needed because block-diag packing would let 0*NaN garbage from other
            # chunks poison valid chunks inside the MXU accumulation.
            col = lax.broadcasted_iota(jnp.int32, (input_dim, tile_b), 1)
            valid = (pl.program_id(0) * tile_b + col) < batch
            xt = jnp.where(valid, xt, jnp.zeros_like(xt))

        # Pack PACK batch sub-chunks onto the sublane/feature axis: (PACK*in, q).
        xp = jnp.concatenate([xt[:, c * q:(c + 1) * q] for c in range(PACK)], axis=0)

        # Layer 1 (packed): (PACK*64, PACK*in) @ (PACK*in, q) -> (PACK*64, q), f32 acc.
        h = jnp.dot(w1_ref[...], xp, preferred_element_type=jnp.float32)
        h = jnp.maximum(h + b1_ref[...], 0.0)

        # Layers 2-4 (packed block-diag 256x256 weights), ReLU after each.
        for i in range(3):
            h = jnp.dot(wmid_ref[i], h.astype(jnp.bfloat16),
                        preferred_element_type=jnp.float32)
            h = jnp.maximum(h + bmid_ref[i], 0.0)

        # Fused layer-5 + theta linear (no ReLU), packed output (PACK*out_dim, q).
        out = jnp.dot(wf_ref[...], h.astype(jnp.bfloat16),
                      preferred_element_type=jnp.float32)
        o_ref[...] = (out + bf_ref[...]).astype(o_ref.dtype)

    return kernel


# ---------------------------------------------------------------------------
# Forward wrappers
# ---------------------------------------------------------------------------
@functools.partial(jax.jit, static_argnames=("tile_b",))
def last_layer_net_forward_packed(x, packed, tile_b=None):
    """x: (B, input_dim) f32; packed: output of prepare_last_layer_params()."""
    B, input_dim = x.shape
    out_dim = packed["wf"].shape[0] // PACK

    if tile_b is None:
        tile_b = _pick_tile_b(B)
    assert tile_b % GRANULE == 0, "tile_b must be a multiple of PACK*128"
    q = tile_b // PACK
    n_tiles = _cdiv(B, tile_b)
    b_pad = n_tiles * tile_b

    # Single cheap transpose + bf16 cast; no zero-pad materialization (ragged last
    # block is handled by Pallas + the in-kernel mask).
    x_t = x.T.astype(jnp.bfloat16)                        # (input_dim, B)

    flops = 2 * b_pad * (input_dim * HIDDEN + 3 * HIDDEN * HIDDEN + HIDDEN * out_dim)
    bytes_accessed = (x_t.size * 2
                      + (packed["w1"].size + packed["wmid"].size + packed["wf"].size) * 2
                      + (packed["b1"].size + packed["bmid"].size + packed["bf"].size) * 4
                      + PACK * out_dim * (b_pad // PACK) * 4)

    kernel = _make_kernel(input_dim, tile_b, B)
    out_p = pl.pallas_call(
        kernel,
        out_shape=jax.ShapeDtypeStruct((PACK * out_dim, b_pad // PACK), jnp.float32),
        grid=(n_tiles,),
        in_specs=[
            pl.BlockSpec((input_dim, tile_b), lambda i: (0, i)),        # x tile
            pl.BlockSpec(packed["w1"].shape, lambda i: (0, 0)),         # w1   (resident)
            pl.BlockSpec(packed["b1"].shape, lambda i: (0, 0)),         # b1
            pl.BlockSpec(packed["wmid"].shape, lambda i: (0, 0, 0)),    # w2..w4
            pl.BlockSpec(packed["bmid"].shape, lambda i: (0, 0, 0)),    # b2..b4
            pl.BlockSpec(packed["wf"].shape, lambda i: (0, 0)),         # fused w5+theta
            pl.BlockSpec(packed["bf"].shape, lambda i: (0, 0)),         # fused bias
        ],
        out_specs=pl.BlockSpec((PACK * out_dim, q), lambda i: (0, i)),
        compiler_params=pltpu.CompilerParams(dimension_semantics=("parallel",)),
        cost_estimate=pl.CostEstimate(flops=flops, transcendentals=0,
                                      bytes_accessed=bytes_accessed),
    )(x_t, packed["w1"], packed["b1"], packed["wmid"], packed["bmid"],
      packed["wf"], packed["bf"])

    # Un-stack the PACK-way chunked layout -> (out_dim, b_pad), drop batch padding,
    # and return in PyTorch layout (B, out_dim).
    out_t = (out_p.reshape(PACK, out_dim, n_tiles, q)
                  .transpose(1, 2, 0, 3)
                  .reshape(out_dim, b_pad))
    return out_t[:, :B].T


@functools.partial(jax.jit, static_argnames=("tile_b",))
def last_layer_net_forward(x, mlp_params, theta_w, theta_b, tile_b=None):
    """One-shot convenience wrapper (weight prep fused into the same jit)."""
    packed = prepare_last_layer_params(mlp_params, theta_w, theta_b)
    return last_layer_net_forward_packed(x, packed, tile_b=tile_b)


# ---------------------------------------------------------------------------
# Initialization + references
# ---------------------------------------------------------------------------
def _linear_init(key, fan_in, fan_out):
    """PyTorch-style uniform(-1/sqrt(fan_in), 1/sqrt(fan_in)); W in (out, in) layout."""
    kw, kb = jax.random.split(key)
    bound = 1.0 / jnp.sqrt(fan_in)
    w = jax.random.uniform(kw, (fan_out, fan_in), jnp.float32, -bound, bound)
    b = jax.random.uniform(kb, (fan_out,), jnp.float32, -bound, bound)
    return w, b


def _reference_forward_f32(x, mlp_params, theta_w, theta_b):
    """Exact PyTorch-semantics reference in f32."""
    h = x
    for i, (w, b) in enumerate(mlp_params):
        h = h @ w.T + b
        if i < len(mlp_params) - 1:
            h = jnp.maximum(h, 0.0)
    return h @ theta_w.T + theta_b


def _reference_forward_matched(x, mlp_params, theta_w, theta_b):
    """Reference with the same bf16-operand / fused-layer arithmetic as the kernel."""
    bf16 = jnp.bfloat16
    (w1, b1), (w2, b2), (w3, b3), (w4, b4), (w5, b5) = mlp_params
    w_fused = theta_w @ w5
    b_fused = theta_w @ b5 + theta_b

    def lin(w, b, h):
        return jnp.dot(w.astype(bf16), h.astype(bf16),
                       preferred_element_type=jnp.float32) + b[:, None]

    h = x.T
    h = jnp.maximum(lin(w1, b1, h), 0.0)
    h = jnp.maximum(lin(w2, b2, h), 0.0)
    h = jnp.maximum(lin(w3, b3, h), 0.0)
    h = jnp.maximum(lin(w4, b4, h), 0.0)
    return lin(w_fused, b_fused, h).T


if __name__ == "__main__":
    input_dim = 32
    output_dim = 8

    key = jax.random.PRNGKey(0)
    keys = jax.random.split(key, 8)

    # base_network: Linear(input_dim,64), then four Linear(64,64).
    dims = [(input_dim, HIDDEN)] + [(HIDDEN, HIDDEN)] * 4
    mlp_params = [_linear_init(keys[1 + i], fi, fo) for i, (fi, fo) in enumerate(dims)]

    # theta = [weight (output_dim, hidden), bias (output_dim,)] (the "last layer").
    tkw, tkb = jax.random.split(keys[6])
    tbound = 1.0 / jnp.sqrt(HIDDEN)
    theta_w = jax.random.uniform(tkw, (output_dim, HIDDEN), jnp.float32, -tbound, tbound)
    theta_b = jax.random.uniform(tkb, (output_dim,), jnp.float32, -tbound, tbound)

    # Hoisted weight prep (done once; reused across forward calls).
    packed = prepare_last_layer_params(mlp_params, theta_w, theta_b)

    # --- Small batch: single (ragged) tile. ---
    x_small = jax.random.normal(keys[0], (8, input_dim), jnp.float32)
    out_small = jax.block_until_ready(last_layer_net_forward_packed(x_small, packed))
    assert out_small.shape == (8, output_dim)

    ref_m = _reference_forward_matched(x_small, mlp_params, theta_w, theta_b)
    assert jnp.allclose(out_small, ref_m, atol=1e-3, rtol=1e-3), "small: mismatch vs matched ref"
    ref_f = _reference_forward_f32(x_small, mlp_params, theta_w, theta_b)
    assert jnp.allclose(out_small, ref_f, atol=3e-2, rtol=3e-2), "small: mismatch vs f32 ref"

    # --- Multi-tile + ragged batch: exercises packing/unpacking and the OOB mask. ---
    x_big = jax.random.normal(keys[7], (1300, input_dim), jnp.float32)
    out_big = jax.block_until_ready(
        last_layer_net_forward(x_big, mlp_params, theta_w, theta_b))
    assert out_big.shape == (1300, output_dim)

    ref_mb = _reference_forward_matched(x_big, mlp_params, theta_w, theta_b)
    assert jnp.allclose(out_big, ref_mb, atol=1e-3, rtol=1e-3), "big: mismatch vs matched ref"
    ref_fb = _reference_forward_f32(x_big, mlp_params, theta_w, theta_b)
    assert jnp.allclose(out_big, ref_fb, atol=5e-2, rtol=5e-2), "big: mismatch vs f32 ref"

    print("KERNEL_OK")
</pallas_src>

<mosaic_0001>
module attributes {stable_mosaic.version = 11 : i64} {
  func.func @kernel(%arg0: i32, %arg1: memref<32x512xbf16, #tpu.memory_space<vmem>>, %arg2: memref<256x128xbf16, #tpu.memory_space<vmem>>, %arg3: memref<256x1xf32, #tpu.memory_space<vmem>>, %arg4: memref<3x256x256xbf16, #tpu.memory_space<vmem>>, %arg5: memref<3x256x1xf32, #tpu.memory_space<vmem>>, %arg6: memref<32x256xbf16, #tpu.memory_space<vmem>>, %arg7: memref<32x1xf32, #tpu.memory_space<vmem>>, %arg8: memref<32x128xf32, #tpu.memory_space<vmem>>) attributes {dimension_semantics = [#tpu.dimension_semantics<parallel>], iteration_bounds = array<i64: 1>, scalar_prefetch = 0 : i64, scratch_operands = 0 : i64, tpu.core_type = #tpu.core_type<tc>, window_params = [{transform_indices = @transform_0, window_bounds = array<i64: 32, 512>}, {pipeline_mode = #tpu.pipeline_mode<synchronous>, transform_indices = @transform_1, window_bounds = array<i64: 256, 128>}, {pipeline_mode = #tpu.pipeline_mode<synchronous>, transform_indices = @transform_2, window_bounds = array<i64: 256, 1>}, {pipeline_mode = #tpu.pipeline_mode<synchronous>, transform_indices = @transform_3, window_bounds = array<i64: 3, 256, 256>}, {pipeline_mode = #tpu.pipeline_mode<synchronous>, transform_indices = @transform_4, window_bounds = array<i64: 3, 256, 1>}, {pipeline_mode = #tpu.pipeline_mode<synchronous>, transform_indices = @transform_5, window_bounds = array<i64: 32, 256>}, {pipeline_mode = #tpu.pipeline_mode<synchronous>, transform_indices = @transform_6, window_bounds = array<i64: 32, 1>}, {transform_indices = @transform_7, window_bounds = array<i64: 32, 128>}]} {
    %c0 = arith.constant 0 : index
    %c0_0 = arith.constant 0 : index
    %0 = vector.load %arg1[%c0, %c0_0] : memref<32x512xbf16, #tpu.memory_space<vmem>>, vector<32x512xbf16>
    %1 = tpu.iota {dimensions = array<i32: 1>} : vector<32x512xi32>
    %c512_i32 = arith.constant 512 : i32
    %2 = arith.muli %arg0, %c512_i32 : i32
    %3 = vector.broadcast %2 : i32 to vector<32x512xi32>
    %4 = arith.addi %3, %1 : vector<32x512xi32>
    %c8_i32 = arith.constant 8 : i32
    %5 = vector.broadcast %c8_i32 : i32 to vector<32x512xi32>
    %6 = arith.cmpi slt, %4, %5 : vector<32x512xi32>
    %cst = arith.constant 0.000000e+00 : bf16
    %7 = vector.broadcast %cst : bf16 to vector<32x512xbf16>
    %8 = arith.select %6, %0, %7 : vector<32x512xi1>, vector<32x512xbf16>
    %9 = vector.extract_strided_slice %8 {offsets = [0, 0], sizes = [32, 128], strides = [1, 1]} : vector<32x512xbf16> to vector<32x128xbf16>
    %10 = vector.extract_strided_slice %8 {offsets = [0, 128], sizes = [32, 128], strides = [1, 1]} : vector<32x512xbf16> to vector<32x128xbf16>
    %11 = vector.extract_strided_slice %8 {offsets = [0, 256], sizes = [32, 128], strides = [1, 1]} : vector<32x512xbf16> to vector<32x128xbf16>
    %12 = vector.extract_strided_slice %8 {offsets = [0, 384], sizes = [32, 128], strides = [1, 1]} : vector<32x512xbf16> to vector<32x128xbf16>
    %13 = tpu.concatenate %9, %10, %11, %12 in 0 : vector<32x128xbf16>, vector<32x128xbf16>, vector<32x128xbf16>, vector<32x128xbf16> -> vector<128x128xbf16>
    %c0_1 = arith.constant 0 : index
    %c0_2 = arith.constant 0 : index
    %14 = vector.load %arg2[%c0_1, %c0_2] : memref<256x128xbf16, #tpu.memory_space<vmem>>, vector<256x128xbf16>
    %cst_3 = arith.constant dense<0.000000e+00> : vector<256x128xf32>
    %15 = tpu.matmul %14, %13, %cst_3 {dimension_numbers = #tpu.dot_dimension_numbers<[1], [0], [0], [1], [0, 0, 1, 1], [], []>} : vector<256x128xbf16>, vector<128x128xbf16>, vector<256x128xf32> -> vector<256x128xf32>
    %c0_4 = arith.constant 0 : index
    %c0_5 = arith.constant 0 : index
    %16 = vector.load %arg3[%c0_4, %c0_5] : memref<256x1xf32, #tpu.memory_space<vmem>>, vector<256x1xf32>
    %17 = vector.broadcast %16 : vector<256x1xf32> to vector<256x128xf32>
    %18 = arith.addf %15, %17 : vector<256x128xf32>
    %cst_6 = arith.constant 0.000000e+00 : f32
    %19 = vector.broadcast %cst_6 : f32 to vector<256x128xf32>
    %20 = arith.maximumf %18, %19 : vector<256x128xf32>
    %c0_7 = arith.constant 0 : index
    %c0_8 = arith.constant 0 : index
    %c0_9 = arith.constant 0 : index
    %21 = vector.load %arg4[%c0_7, %c0_8, %c0_9] : memref<3x256x256xbf16, #tpu.memory_space<vmem>>, vector<1x256x256xbf16>
    %22 = vector.shape_cast %21 : vector<1x256x256xbf16> to vector<256x256xbf16>
    %23 = arith.truncf %20 : vector<256x128xf32> to vector<256x128xbf16>
    %cst_10 = arith.constant dense<0.000000e+00> : vector<256x128xf32>
    %24 = tpu.matmul %22, %23, %cst_10 {dimension_numbers = #tpu.dot_dimension_numbers<[1], [0], [0], [1], [0, 0, 1, 1], [], []>} : vector<256x256xbf16>, vector<256x128xbf16>, vector<256x128xf32> -> vector<256x128xf32>
    %c0_11 = arith.constant 0 : index
    %c0_12 = arith.constant 0 : index
    %c0_13 = arith.constant 0 : index
    %25 = vector.load %arg5[%c0_11, %c0_12, %c0_13] : memref<3x256x1xf32, #tpu.memory_space<vmem>>, vector<1x256x1xf32>
    %26 = vector.shape_cast %25 : vector<1x256x1xf32> to vector<256x1xf32>
    %27 = vector.broadcast %26 : vector<256x1xf32> to vector<256x128xf32>
    %28 = arith.addf %24, %27 : vector<256x128xf32>
    %cst_14 = arith.constant 0.000000e+00 : f32
    %29 = vector.broadcast %cst_14 : f32 to vector<256x128xf32>
    %30 = arith.maximumf %28, %29 : vector<256x128xf32>
    %c1 = arith.constant 1 : index
    %c0_15 = arith.constant 0 : index
    %c0_16 = arith.constant 0 : index
    %31 = vector.load %arg4[%c1, %c0_15, %c0_16] : memref<3x256x256xbf16, #tpu.memory_space<vmem>>, vector<1x256x256xbf16>
    %32 = vector.shape_cast %31 : vector<1x256x256xbf16> to vector<256x256xbf16>
    %33 = arith.truncf %30 : vector<256x128xf32> to vector<256x128xbf16>
    %cst_17 = arith.constant dense<0.000000e+00> : vector<256x128xf32>
    %34 = tpu.matmul %32, %33, %cst_17 {dimension_numbers = #tpu.dot_dimension_numbers<[1], [0], [0], [1], [0, 0, 1, 1], [], []>} : vector<256x256xbf16>, vector<256x128xbf16>, vector<256x128xf32> -> vector<256x128xf32>
    %c1_18 = arith.constant 1 : index
    %c0_19 = arith.constant 0 : index
    %c0_20 = arith.constant 0 : index
    %35 = vector.load %arg5[%c1_18, %c0_19, %c0_20] : memref<3x256x1xf32, #tpu.memory_space<vmem>>, vector<1x256x1xf32>
    %36 = vector.shape_cast %35 : vector<1x256x1xf32> to vector<256x1xf32>
    %37 = vector.broadcast %36 : vector<256x1xf32> to vector<256x128xf32>
    %38 = arith.addf %34, %37 : vector<256x128xf32>
    %cst_21 = arith.constant 0.000000e+00 : f32
    %39 = vector.broadcast %cst_21 : f32 to vector<256x128xf32>
    %40 = arith.maximumf %38, %39 : vector<256x128xf32>
    %c2 = arith.constant 2 : index
    %c0_22 = arith.constant 0 : index
    %c0_23 = arith.constant 0 : index
    %41 = vector.load %arg4[%c2, %c0_22, %c0_23] : memref<3x256x256xbf16, #tpu.memory_space<vmem>>, vector<1x256x256xbf16>
    %42 = vector.shape_cast %41 : vector<1x256x256xbf16> to vector<256x256xbf16>
    %43 = arith.truncf %40 : vector<256x128xf32> to vector<256x128xbf16>
    %cst_24 = arith.constant dense<0.000000e+00> : vector<256x128xf32>
    %44 = tpu.matmul %42, %43, %cst_24 {dimension_numbers = #tpu.dot_dimension_numbers<[1], [0], [0], [1], [0, 0, 1, 1], [], []>} : vector<256x256xbf16>, vector<256x128xbf16>, vector<256x128xf32> -> vector<256x128xf32>
    %c2_25 = arith.constant 2 : index
    %c0_26 = arith.constant 0 : index
    %c0_27 = arith.constant 0 : index
    %45 = vector.load %arg5[%c2_25, %c0_26, %c0_27] : memref<3x256x1xf32, #tpu.memory_space<vmem>>, vector<1x256x1xf32>
    %46 = vector.shape_cast %45 : vector<1x256x1xf32> to vector<256x1xf32>
    %47 = vector.broadcast %46 : vector<256x1xf32> to vector<256x128xf32>
    %48 = arith.addf %44, %47 : vector<256x128xf32>
    %cst_28 = arith.constant 0.000000e+00 : f32
    %49 = vector.broadcast %cst_28 : f32 to vector<256x128xf32>
    %50 = arith.maximumf %48, %49 : vector<256x128xf32>
    %c0_29 = arith.constant 0 : index
    %c0_30 = arith.constant 0 : index
    %51 = vector.load %arg6[%c0_29, %c0_30] : memref<32x256xbf16, #tpu.memory_space<vmem>>, vector<32x256xbf16>
    %52 = arith.truncf %50 : vector<256x128xf32> to vector<256x128xbf16>
    %cst_31 = arith.constant dense<0.000000e+00> : vector<32x128xf32>
    %53 = tpu.matmul %51, %52, %cst_31 {dimension_numbers = #tpu.dot_dimension_numbers<[1], [0], [0], [1], [0, 0, 1, 1], [], []>} : vector<32x256xbf16>, vector<256x128xbf16>, vector<32x128xf32> -> vector<32x128xf32>
    %c0_32 = arith.constant 0 : index
    %c0_33 = arith.constant 0 : index
    %54 = vector.load %arg7[%c0_32, %c0_33] : memref<32x1xf32, #tpu.memory_space<vmem>>, vector<32x1xf32>
    %55 = vector.broadcast %54 : vector<32x1xf32> to vector<32x128xf32>
    %56 = arith.addf %53, %55 : vector<32x128xf32>
    %c0_34 = arith.constant 0 : index
    %c0_35 = arith.constant 0 : index
    %57 = vector.load %arg8[%c0_34, %c0_35] : memref<32x128xf32, #tpu.memory_space<vmem>>, vector<32x128xf32>
    tpu.vector_store %arg8[%c0_34, %c0_35], %56 {strides = array<i32>} : memref<32x128xf32, #tpu.memory_space<vmem>>, vector<32x128xf32>,
    return
  }
  func.func @transform_0(%arg0: i32) -> (i32, i32) {
    %c0_i32 = arith.constant 0 : i32
    %c0_i32_0 = arith.constant 0 : i32
    return %c0_i32, %arg0 : i32, i32
  }
  func.func @transform_1(%arg0: i32) -> (i32, i32) {
    %c0_i32 = arith.constant 0 : i32
    %c0_i32_0 = arith.constant 0 : i32
    %c0_i32_1 = arith.constant 0 : i32
    return %c0_i32, %c0_i32_0 : i32, i32
  }
  func.func @transform_2(%arg0: i32) -> (i32, i32) {
    %c0_i32 = arith.constant 0 : i32
    %c0_i32_0 = arith.constant 0 : i32
    %c0_i32_1 = arith.constant 0 : i32
    return %c0_i32, %c0_i32_0 : i32, i32
  }
  func.func @transform_3(%arg0: i32) -> (i32, i32, i32) {
    %c0_i32 = arith.constant 0 : i32
    %c0_i32_0 = arith.constant 0 : i32
    %c0_i32_1 = arith.constant 0 : i32
    %c0_i32_2 = arith.constant 0 : i32
    return %c0_i32, %c0_i32_0, %c0_i32_1 : i32, i32, i32
  }
  func.func @transform_4(%arg0: i32) -> (i32, i32, i32) {
    %c0_i32 = arith.constant 0 : i32
    %c0_i32_0 = arith.constant 0 : i32
    %c0_i32_1 = arith.constant 0 : i32
    %c0_i32_2 = arith.constant 0 : i32
    return %c0_i32, %c0_i32_0, %c0_i32_1 : i32, i32, i32
  }
  func.func @transform_5(%arg0: i32) -> (i32, i32) {
    %c0_i32 = arith.constant 0 : i32
    %c0_i32_0 = arith.constant 0 : i32
    %c0_i32_1 = arith.constant 0 : i32
    return %c0_i32, %c0_i32_0 : i32, i32
  }
  func.func @transform_6(%arg0: i32) -> (i32, i32) {
    %c0_i32 = arith.constant 0 : i32
    %c0_i32_0 = arith.constant 0 : i32
    %c0_i32_1 = arith.constant 0 : i32
    return %c0_i32, %c0_i32_0 : i32, i32
  }
  func.func @transform_7(%arg0: i32) -> (i32, i32) {
    %c0_i32 = arith.constant 0 : i32
    %c0_i32_0 = arith.constant 0 : i32
    return %c0_i32, %arg0 : i32, i32
  }
}

</mosaic_0001>

<bundles_post_ra>
// kernel: last_layer_net_forward_packed.1
= control target key start
LH: loop header
LB: loop body
LE: loop exit
PB: predicated region body
PF: predicated region fallthrough
CT: control target
= control target key end

     0   :  { %v88_v2 = vlaneseq  ;;  %v3432_v3 = vmov 0   ;;  %vm3433_vm1 = vmmov 0   ;;  %v81_v30 = vld [vmem:[#allocation2 + $0x8] sm:$0xff]  ;;  %v83_v31 = vld [vmem:[#allocation2 + $0x18] sm:$0xff]  ;;  %s4587_s0 = inlined_call_operand.vmem [shape: bf16[32,8], index: 0, kind: input, shape index: {}]   ;;  %s4588_s1 = inlined_call_operand.vmem [shape: bf16[256,128], index: 1, kind: input, shape index: {}]   ;;  %s4589_s2 = inlined_call_operand.vmem [shape: f32[256,1], index: 2, kind: input, shape index: {}]   ;;  %s4590_s3 = inlined_call_operand.vmem [shape: bf16[3,256,256], index: 3, kind: input, shape index: {}]   ;;  %s4591_s4 = inlined_call_operand.vmem [shape: f32[3,256,1], index: 4, kind: input, shape index: {}]   ;;  %s4592_s5 = inlined_call_operand.vmem [shape: bf16[32,256], index: 5, kind: input, shape index: {}]   ;;  %s4593_s6 = inlined_call_operand.vmem [shape: f32[32,1], index: 6, kind: input, shape index: {}]   ;;  %s4594_s7 = inlined_call_operand.vmem [shape: f32[32,128], index: 7, kind: output, shape index: {}]  }
   0x1   :  { %v201_v0 = vld [vmem:[%s4589_s2 + $0x80] sm:$0xff]  ;;  %3265 = vset.pattern.permute.xlu1 %v3432_v3  ;;  %3264 = vset.pattern.permute.xlu0 %v3432_v3  ;;  %v202_v7 = vld [vmem:[%s4589_s2 + $0x88] sm:$0xff]  ;;  %v203_v11 = vld [vmem:[%s4589_s2 + $0x90] sm:$0xff] }
   0x2   :  { %v185_v1 = vld [vmem:[%s4589_s2] sm:$0xff]  ;;  %299 = vperm.xlu0 %3264, %v201_v0   ;;  %v89_v6 = vand.u32 127, %v88_v2  ;;  %v186_v8 = vld [vmem:[%s4589_s2 + $0x8] sm:$0xff]  ;;  %v204_v12 = vld [vmem:[%s4589_s2 + $0x98] sm:$0xff] }
   0x3   :  { %219 = vperm.xlu1 %3265, %v185_v1   ;;  %v29_v4 = vld [vmem:[%s4587_s0] sm:$0xf]  ;;  %v31_v5 = vld [vmem:[%s4587_s0 + $0x4] sm:$0xf]  ;;  %v33_v9 = vld [vmem:[%s4587_s0 + $0x8] sm:$0xf] }
   0x4   :  { %30 = vst [vmem:[#allocation2] sm:$0xf] %v29_v4  ;;  %32 = vst [vmem:[#allocation2 + $0x10] sm:$0xf] %v31_v5  ;;  %v35_v10 = vld [vmem:[%s4587_s0 + $0xc] sm:$0xf] }
   0x5   :  { %34 = vst [vmem:[#allocation2 + $0x20] sm:$0xf] %v33_v9  ;;  %vm99_vm0 = vcmp.lt.s32.totalorder %v89_v6, 8  ;;  %36 = vst [vmem:[#allocation2 + $0x30] sm:$0xf] %v35_v10  ;;  %v187_v15 = vld [vmem:[%s4589_s2 + $0x10] sm:$0xff] }
   0x6   :  { %304 = vperm.xlu0 %3264, %v202_v7   ;;  %vm103_vm2 = vmpackc.low %vm3433_vm1, %vm99_vm0  ;;  %v188_v18 = vld [vmem:[%s4589_s2 + $0x18] sm:$0xff]  ;;  %v3266_v23 = vld [vmem:[%s4588_s1] sm:$0xff]  }
   0x7   :  { %224 = vperm.xlu1 %3265, %v186_v8   ;;  %v205_v26 = vld [vmem:[%s4589_s2 + $0xa0] sm:$0xff]  ;;  %v206_v28 = vld [vmem:[%s4589_s2 + $0xa8] sm:$0xff]  ;;  %3230 = vmatprep.mubr.bf16.mxu0 %v3266_v23  ;;  %vm3522_vm3 = vmpackc.low %vm3433_vm1, %vm3433_vm1 }
   0x8   :  { %v189_v32 = vld [vmem:[%s4589_s2 + $0x20] sm:$0xff]  ;;  %v190_v33 = vld [vmem:[%s4589_s2 + $0x28] sm:$0xff]  ;;  %v106_v35 = vsel %vm3522_vm3, %v81_v30, 0  ;;  %v108_v36 = vsel %vm3522_vm3, %v83_v31, 0  ;;  %v87_v38 = vld [vmem:[#allocation2 + $0x38] sm:$0xff] }
   0x9   :  { %v85_v37 = vld [vmem:[#allocation2 + $0x28] sm:$0xff]  ;;  %v207_v39 = vld [vmem:[%s4589_s2 + $0xb0] sm:$0xff]  ;;  %v208_v40 = vld [vmem:[%s4589_s2 + $0xb8] sm:$0xff]  ;;  %v2578_v41 = vcombine.low %v106_v35, %v108_v36  ;;  %v112_v43 = vsel %vm3522_vm3, %v87_v38, 0  ;;  %v2580_v49 = vcombine.high %v106_v35, %v108_v36 }
   0xa   :  { %309 = vperm.xlu0 %3264, %v203_v11   ;;  %v110_v42 = vsel %vm3522_vm3, %v85_v37, 0  ;;  %v191_v44 = vld [vmem:[%s4589_s2 + $0x30] sm:$0xff]  ;;  %v192_v45 = vld [vmem:[%s4589_s2 + $0x38] sm:$0xff]  ;;  %v209_v47 = vld [vmem:[%s4589_s2 + $0xc0] sm:$0xff] }
   0xb   :  { %314 = vperm.xlu1 %3265, %v204_v12   ;;  %v80_v13 = vld [vmem:[#allocation2] sm:$0xff]  ;;  %v82_v14 = vld [vmem:[#allocation2 + $0x10] sm:$0xff]  ;;  %v2579_v46 = vcombine.low %v110_v42, %v112_v43  ;;  %v210_v48 = vld [vmem:[%s4589_s2 + $0xc8] sm:$0xff]  ;;  %v2581_v52 = vcombine.high %v110_v42, %v112_v43 }
   0xc   :  { %v105_v16 = vsel %vm103_vm2, %v80_v13, 0  ;;  %v107_v17 = vsel %vm103_vm2, %v82_v14, 0  ;;  %v84_v19 = vld [vmem:[#allocation2 + $0x20] sm:$0xff]  ;;  %v86_v21 = vld [vmem:[#allocation2 + $0x30] sm:$0xff]  ;;  %v194_v51 = vld [vmem:[%s4589_s2 + $0x48] sm:$0xff] }
   0xd   :  { %v2574_v20 = vcombine.low %v105_v16, %v107_v17  ;;  %v109_v22 = vsel %vm103_vm2, %v84_v19, 0  ;;  %v111_v24 = vsel %vm103_vm2, %v86_v21, 0  ;;  %v2576_v27 = vcombine.high %v105_v16, %v107_v17  ;;  %v193_v50 = vld [vmem:[%s4589_s2 + $0x40] sm:$0xff]  ;;  %v211_v53 = vld [vmem:[%s4589_s2 + $0xd0] sm:$0xff]  ;;  %v212_v54 = vld [vmem:[%s4589_s2 + $0xd8] sm:$0xff] }
   0xe   :  { %229 = vperm.xlu0 %3264, %v187_v15   ;;  %v2575_v25 = vcombine.low %v109_v22, %v111_v24  ;;  %v2577_v34 = vcombine.high %v109_v22, %v111_v24  ;;  %v3267_v55 = vld [vmem:[%s4588_s1 + $0x8] sm:$0xff]   ;;  %v195_v56 = vld [vmem:[%s4589_s2 + $0x50] sm:$0xff]  ;;  %v196_v58 = vld [vmem:[%s4589_s2 + $0x58] sm:$0xff] }
   0xf   :  { %3214 = vmatprep.subr.bf16.mxu0 %v2574_v20  ;;  %234 = vperm.xlu1 %3265, %v188_v18   ;;  %v3268_v57 = vld [vmem:[%s4588_s1 + $0x10] sm:$0xff]   ;;  %v213_v59 = vld [vmem:[%s4589_s2 + $0xe0] sm:$0xff]  ;;  %v214_v60 = vld [vmem:[%s4589_s2 + $0xe8] sm:$0xff] }
  0x10   :  { %3215 = vmatpush3.bf16.msra.mxu0 %v2574_v20  ;;  %v3269_v61 = vld [vmem:[%s4588_s1 + $0x18] sm:$0xff]   ;;  %v197_v62 = vld [vmem:[%s4589_s2 + $0x60] sm:$0xff]  ;;  %v198_v63 = vld [vmem:[%s4589_s2 + $0x68] sm:$0xff] }
  0x11   :  { %3216 = vmatprep.subr.bf16.mxu0 %v2575_v25  ;;  %v3270_v0 = vld [vmem:[%s4588_s1 + $0x20] sm:$0xff]   ;;  %v215_v1 = vld [vmem:[%s4589_s2 + $0xf0] sm:$0xff]  ;;  %v216_v2 = vld [vmem:[%s4589_s2 + $0xf8] sm:$0xff] }
  0x12   :  { %319 = vperm.xlu0 %3264, %v205_v26   ;;  %v3271_v3 = vld [vmem:[%s4588_s1 + $0x28] sm:$0xff]   ;;  %v199_v4 = vld [vmem:[%s4589_s2 + $0x70] sm:$0xff]  ;;  %v200_v5 = vld [vmem:[%s4589_s2 + $0x78] sm:$0xff] }
  0x13   :  { %324 = vperm.xlu1 %3265, %v206_v28   ;;  %v3272_v6 = vld [vmem:[%s4588_s1 + $0x30] sm:$0xff]   ;;  %v730_v7 = vld [vmem:[%s4591_s4 + $0x80] sm:$0xff]  ;;  %v731_v8 = vld [vmem:[%s4591_s4 + $0x88] sm:$0xff] }
  0x14   :  { %3217 = vmatpush3.bf16.msra.mxu0 %v2575_v25  ;;  %v3273_v9 = vld [vmem:[%s4588_s1 + $0x38] sm:$0xff]   ;;  %v714_v10 = vld [vmem:[%s4591_s4] sm:$0xff]  ;;  %v715_v11 = vld [vmem:[%s4591_s4 + $0x8] sm:$0xff] }
  0x15   :  { %3218 = vmatprep.subr.bf16.mxu0 %v2576_v27  ;;  %v3274_v12 = vld [vmem:[%s4588_s1 + $0x40] sm:$0xff]   ;;  %v732_v13 = vld [vmem:[%s4591_s4 + $0x90] sm:$0xff]  ;;  %v733_v14 = vld [vmem:[%s4591_s4 + $0x98] sm:$0xff] }
  0x16   :  { %239 = vperm.xlu0 %3264, %v189_v32   ;;  %v3275_v15 = vld [vmem:[%s4588_s1 + $0x48] sm:$0xff]   ;;  %v716_v16 = vld [vmem:[%s4591_s4 + $0x10] sm:$0xff]  ;;  %v717_v17 = vld [vmem:[%s4591_s4 + $0x18] sm:$0xff] }
  0x17   :  { %244 = vperm.xlu1 %3265, %v190_v33   ;;  %v3276_v18 = vld [vmem:[%s4588_s1 + $0x50] sm:$0xff]   ;;  %v734_v19 = vld [vmem:[%s4591_s4 + $0xa0] sm:$0xff]  ;;  %v735_v20 = vld [vmem:[%s4591_s4 + $0xa8] sm:$0xff] }
  0x18   :  { %3219 = vmatpush3.bf16.msra.mxu0 %v2576_v27  ;;  %v3277_v21 = vld [vmem:[%s4588_s1 + $0x58] sm:$0xff]   ;;  %v718_v22 = vld [vmem:[%s4591_s4 + $0x20] sm:$0xff]  ;;  %v719_v23 = vld [vmem:[%s4591_s4 + $0x28] sm:$0xff] }
  0x19   :  { %3220 = vmatprep.subr.bf16.mxu0 %v2577_v34  ;;  %v3278_v24 = vld [vmem:[%s4588_s1 + $0x60] sm:$0xff]   ;;  %v736_v25 = vld [vmem:[%s4591_s4 + $0xb0] sm:$0xff]  ;;  %v737_v26 = vld [vmem:[%s4591_s4 + $0xb8] sm:$0xff] }
  0x1a   :  { %329 = vperm.xlu0 %3264, %v207_v39   ;;  %v3279_v27 = vld [vmem:[%s4588_s1 + $0x68] sm:$0xff]   ;;  %v720_v28 = vld [vmem:[%s4591_s4 + $0x30] sm:$0xff]  ;;  %v721_v30 = vld [vmem:[%s4591_s4 + $0x38] sm:$0xff] }
  0x1b   :  { %334 = vperm.xlu1 %3265, %v208_v40   ;;  %v3280_v29 = vld [vmem:[%s4588_s1 + $0x70] sm:$0xff]   ;;  %v738_v31 = vld [vmem:[%s4591_s4 + $0xc0] sm:$0xff]  ;;  %v739_v32 = vld [vmem:[%s4591_s4 + $0xc8] sm:$0xff] }
  0x1c   :  { %3221 = vmatpush3.bf16.msra.mxu0 %v2577_v34  ;;  %v3281_v33 = vld [vmem:[%s4588_s1 + $0x78] sm:$0xff]   ;;  %v722_v34 = vld [vmem:[%s4591_s4 + $0x40] sm:$0xff]  ;;  %v723_v35 = vld [vmem:[%s4591_s4 + $0x48] sm:$0xff] }
  0x1d   :  { %3222 = vmatprep.subr.bf16.mxu0 %v2578_v41  ;;  %v740_v36 = vld [vmem:[%s4591_s4 + $0xd0] sm:$0xff]  ;;  %v741_v37 = vld [vmem:[%s4591_s4 + $0xd8] sm:$0xff]  ;;  %v742_v40 = vld [vmem:[%s4591_s4 + $0xe0] sm:$0xff] }
  0x1e   :  { %249 = vperm.xlu0 %3264, %v191_v44   ;;  %v724_v38 = vld [vmem:[%s4591_s4 + $0x50] sm:$0xff]  ;;  %v725_v39 = vld [vmem:[%s4591_s4 + $0x58] sm:$0xff]  ;;  %v726_v42 = vld [vmem:[%s4591_s4 + $0x60] sm:$0xff] }
  0x1f   :  { %254 = vperm.xlu1 %3265, %v192_v45   ;;  %v727_v43 = vld [vmem:[%s4591_s4 + $0x68] sm:$0xff]  ;;  %v744_v44 = vld [vmem:[%s4591_s4 + $0xf0] sm:$0xff]  ;;  %v745_v45 = vld [vmem:[%s4591_s4 + $0xf8] sm:$0xff] }
  0x20   :  { %3223 = vmatpush3.bf16.msra.mxu0 %v2578_v41  ;;  %v743_v41 = vld [vmem:[%s4591_s4 + $0xe8] sm:$0xff] }
  0x21   :  { %3224 = vmatprep.subr.bf16.mxu0 %v2579_v46 }
  0x22   :  { %339 = vperm.xlu0 %3264, %v209_v47   ;;  %v729_v47 = vld [vmem:[%s4591_s4 + $0x78] sm:$0xff] }
  0x23   :  { %344 = vperm.xlu1 %3265, %v210_v48   ;;  %v2678_v48 = vld [vmem:[%s4591_s4 + $0x180] sm:$0xff] }
  0x24   :  { %3225 = vmatpush3.bf16.msra.mxu0 %v2579_v46  ;;  %v728_v46 = vld [vmem:[%s4591_s4 + $0x70] sm:$0xff] }
  0x25   :  { %3226 = vmatprep.subr.bf16.mxu0 %v2580_v49 }
  0x26   :  { %259 = vperm.xlu0 %3264, %v193_v50   ;;  %v2662_v50 = vld [vmem:[%s4591_s4 + $0x100] sm:$0xff] }
  0x27   :  { %264 = vperm.xlu1 %3265, %v194_v51   ;;  %v2663_v51 = vld [vmem:[%s4591_s4 + $0x108] sm:$0xff] }
  0x28   :  { %3227 = vmatpush3.bf16.msra.mxu0 %v2580_v49  ;;  %v2679_v49 = vld [vmem:[%s4591_s4 + $0x188] sm:$0xff] }
  0x29   :  { %3228 = vmatprep.subr.bf16.mxu0 %v2581_v52 }
  0x2a   :  { %349 = vperm.xlu0 %3264, %v211_v53   ;;  %v2681_v53 = vld [vmem:[%s4591_s4 + $0x198] sm:$0xff] }
  0x2b   :  { %354 = vperm.xlu1 %3265, %v212_v54   ;;  %v2664_v54 = vld [vmem:[%s4591_s4 + $0x110] sm:$0xff] }
  0x2c   :  { %3229 = vmatpush3.bf16.msra.mxu0 %v2581_v52  ;;  %v2680_v52 = vld [vmem:[%s4591_s4 + $0x190] sm:$0xff] }
  0x2e   :  { %269 = vperm.xlu0 %3264, %v195_v56   ;;  %v2682_v56 = vld [vmem:[%s4591_s4 + $0x1a0] sm:$0xff] }
  0x2f   :  { %3231 = vmatmul.mubr.bf16.vlgmr.msra.gmra.mrb[0].mxu0 %v3267_v55  ;;  %274 = vperm.xlu1 %3265, %v196_v58   ;;  %v2665_v55 = vld [vmem:[%s4591_s4 + $0x118] sm:$0xff]  ;;  %v2666_v58 = vld [vmem:[%s4591_s4 + $0x120] sm:$0xff] }
  0x30   :  { %3234 = vmatprep.mubr.bf16.mxu0 %v3268_v57  ;;  %v2683_v57 = vld [vmem:[%s4591_s4 + $0x1a8] sm:$0xff] }
  0x32   :  { %359 = vperm.xlu0 %3264, %v213_v59   ;;  %v2667_v59 = vld [vmem:[%s4591_s4 + $0x128] sm:$0xff] }
  0x33   :  { %364 = vperm.xlu1 %3265, %v214_v60   ;;  %v2684_v60 = vld [vmem:[%s4591_s4 + $0x1b0] sm:$0xff] }
  0x36   :  { %279 = vperm.xlu0 %3264, %v197_v62   ;;  %v2668_v62 = vld [vmem:[%s4591_s4 + $0x130] sm:$0xff] }
  0x37   :  { %3235 = vmatmul.mubr.bf16.gmra.mrb[4].mxu0 %v3269_v61  ;;  %284 = vperm.xlu1 %3265, %v198_v63   ;;  %v2685_v61 = vld [vmem:[%s4591_s4 + $0x1b8] sm:$0xff] }
  0x38   :  { %3238 = vmatprep.mubr.bf16.mxu0 %v3270_v0  ;;  %v2669_v63 = vld [vmem:[%s4591_s4 + $0x138] sm:$0xff]  ;;  %v2686_v0 = vld [vmem:[%s4591_s4 + $0x1c0] sm:$0xff] }
  0x3a   :  { %369 = vperm.xlu0 %3264, %v215_v1   ;;  %v2687_v1 = vld [vmem:[%s4591_s4 + $0x1c8] sm:$0xff] }
  0x3b   :  { %374 = vperm.xlu1 %3265, %v216_v2   ;;  %v2670_v2 = vld [vmem:[%s4591_s4 + $0x140] sm:$0xff] }
  0x3e   :  { %289 = vperm.xlu0 %3264, %v199_v4  }
  0x3f   :  { %3239 = vmatmul.mubr.bf16.gmra.mrb[8].mxu0 %v3271_v3  ;;  %294 = vperm.xlu1 %3265, %v200_v5   ;;  %v2671_v3 = vld [vmem:[%s4591_s4 + $0x148] sm:$0xff] }
  0x40   :  { %3242 = vmatprep.mubr.bf16.mxu0 %v3272_v6  ;;  %v2688_v6 = vld [vmem:[%s4591_s4 + $0x1d0] sm:$0xff] }
  0x42   :  { %828 = vperm.xlu0 %3264, %v730_v7   ;;  %v2689_v7 = vld [vmem:[%s4591_s4 + $0x1d8] sm:$0xff] }
  0x43   :  { %833 = vperm.xlu1 %3265, %v731_v8   ;;  %v2672_v8 = vld [vmem:[%s4591_s4 + $0x150] sm:$0xff] }
  0x46   :  { %748 = vperm.xlu0 %3264, %v714_v10   ;;  %v2673_v10 = vld [vmem:[%s4591_s4 + $0x158] sm:$0xff] }
  0x47   :  { %3243 = vmatmul.mubr.bf16.gmra.mrb[12].mxu0 %v3273_v9  ;;  %753 = vperm.xlu1 %3265, %v715_v11  }
  0x48   :  { %3246 = vmatprep.mubr.bf16.mxu0 %v3274_v12  ;;  %v2690_v12 = vld [vmem:[%s4591_s4 + $0x1e0] sm:$0xff] }
  0x4a   :  { %838 = vperm.xlu0 %3264, %v732_v13   ;;  %v2691_v13 = vld [vmem:[%s4591_s4 + $0x1e8] sm:$0xff] }
  0x4b   :  { %843 = vperm.xlu1 %3265, %v733_v14  }
  0x4e   :  { %758 = vperm.xlu0 %3264, %v716_v16   ;;  %v2674_v16 = vld [vmem:[%s4591_s4 + $0x160] sm:$0xff] }
  0x4f   :  { %3247 = vmatmul.mubr.bf16.gmra.mrb[16].mxu0 %v3275_v15  ;;  %763 = vperm.xlu1 %3265, %v717_v17   ;;  %v2675_v17 = vld [vmem:[%s4591_s4 + $0x168] sm:$0xff] }
  0x50   :  { %3250 = vmatprep.mubr.bf16.mxu0 %v3276_v18  ;;  %v2692_v18 = vld [vmem:[%s4591_s4 + $0x1f0] sm:$0xff] }
  0x52   :  { %848 = vperm.xlu0 %3264, %v734_v19  }
  0x53   :  { %853 = vperm.xlu1 %3265, %v735_v20   ;;  %v2693_v20 = vld [vmem:[%s4591_s4 + $0x1f8] sm:$0xff] }
  0x56   :  { %768 = vperm.xlu0 %3264, %v718_v22   ;;  %v2676_v22 = vld [vmem:[%s4591_s4 + $0x170] sm:$0xff] }
  0x57   :  { %3251 = vmatmul.mubr.bf16.gmra.mrb[20].mxu0 %v3277_v21  ;;  %773 = vperm.xlu1 %3265, %v719_v23   ;;  %v2677_v23 = vld [vmem:[%s4591_s4 + $0x178] sm:$0xff] }
  0x58   :  { %3254 = vmatprep.mubr.bf16.mxu0 %v3278_v24 }
  0x5a   :  { %858 = vperm.xlu0 %3264, %v736_v25  }
  0x5b   :  { %863 = vperm.xlu1 %3265, %v737_v26   ;;  %v2774_v26 = vld [vmem:[%s4591_s4 + $0x280] sm:$0xff] }
  0x5e   :  { %778 = vperm.xlu0 %3264, %v720_v28   ;;  %v2758_v28 = vld [vmem:[%s4591_s4 + $0x200] sm:$0xff] }
  0x5f   :  { %3255 = vmatmul.mubr.bf16.gmra.mrb[24].mxu0 %v3279_v27  ;;  %783 = vperm.xlu1 %3265, %v721_v30   ;;  %v2775_v27 = vld [vmem:[%s4591_s4 + $0x288] sm:$0xff] }
  0x60   :  { %3258 = vmatprep.mubr.bf16.mxu0 %v3280_v29  ;;  %v2759_v30 = vld [vmem:[%s4591_s4 + $0x208] sm:$0xff] }
  0x62   :  { %868 = vperm.xlu0 %3264, %v738_v31  }
  0x63   :  { %873 = vperm.xlu1 %3265, %v739_v32   ;;  %v2776_v32 = vld [vmem:[%s4591_s4 + $0x290] sm:$0xff] }
  0x66   :  { %788 = vperm.xlu0 %3264, %v722_v34   ;;  %v3284_v34 = vld [vmem:[%s4590_s3 + $0x4] ss:$8 sps:$4 sm:$0xff]  }
  0x67   :  { %3259 = vmatmul.mubr.bf16.gmra.mrb[28].mxu0 %v3281_v33  ;;  %793 = vperm.xlu1 %3265, %v723_v35   ;;  %v2777_v33 = vld [vmem:[%s4591_s4 + $0x298] sm:$0xff] }
  0x68   :  { %1098 = vmatprep.mubr.bf16.mxu1 %v3284_v34 }
  0x6a   :  { %878 = vperm.xlu0 %3264, %v740_v36  }
  0x6b   :  { %883 = vperm.xlu1 %3265, %v741_v37   ;;  %v2760_v37 = vld [vmem:[%s4591_s4 + $0x210] sm:$0xff] }
  0x6e   :  { %798 = vperm.xlu0 %3264, %v724_v38   ;;  %v2761_v38 = vld [vmem:[%s4591_s4 + $0x218] sm:$0xff] }
  0x6f   :  { %803 = vperm.xlu1 %3265, %v725_v39   ;;  %v2778_v39 = vld [vmem:[%s4591_s4 + $0x2a0] sm:$0xff] }
  0x72   :  { %888 = vperm.xlu0 %3264, %v742_v40  }
  0x73   :  { %893 = vperm.xlu1 %3265, %v743_v41   ;;  %v2779_v41 = vld [vmem:[%s4591_s4 + $0x2a8] sm:$0xff] }
  0x76   :  { %808 = vperm.xlu0 %3264, %v726_v42  }
  0x77   :  { %813 = vperm.xlu1 %3265, %v727_v43   ;;  %v2762_v43 = vld [vmem:[%s4591_s4 + $0x220] sm:$0xff] }
  0x7a   :  { %898 = vperm.xlu0 %3264, %v744_v44   ;;  %v2763_v44 = vld [vmem:[%s4591_s4 + $0x228] sm:$0xff] }
  0x7b   :  { %903 = vperm.xlu1 %3265, %v745_v45  }
  0x7e   :  { %818 = vperm.xlu0 %3264, %v728_v46  }
  0x7f   :  { %823 = vperm.xlu1 %3265, %v729_v47   ;;  %v2780_v47 = vld [vmem:[%s4591_s4 + $0x2b0] sm:$0xff] }
  0x81   :  { %v3801_v4 = vpop.permute.xlu0 %299 }
  0x82   :  { %1423 = vperm.xlu0 %3264, %v2678_v48   ;;  %v3803_v5 = vpop.permute.xlu1 %219  ;;  %v2781_v48 = vld [vmem:[%s4591_s4 + $0x2b8] sm:$0xff] }
  0x83   :  { %1428 = vperm.xlu1 %3265, %v2679_v49   ;;  %v2764_v49 = vld [vmem:[%s4591_s4 + $0x230] sm:$0xff] }
  0x85   :  { %v3814_v9 = vpop.permute.xlu0 %304 }
  0x86   :  { %1343 = vperm.xlu0 %3264, %v2662_v50   ;;  %v3819_v11 = vpop.permute.xlu1 %224 }
  0x87   :  { %1348 = vperm.xlu1 %3265, %v2663_v51   ;;  %v2765_v51 = vld [vmem:[%s4591_s4 + $0x238] sm:$0xff] }
  0x89   :  { %v3827_v14 = vpop.permute.xlu0 %309 }
  0x8a   :  { %1433 = vperm.xlu0 %3264, %v2680_v52   ;;  %v3829_v15 = vpop.permute.xlu1 %314 }
  0x8b   :  { %1438 = vperm.xlu1 %3265, %v2681_v53   ;;  %v2782_v53 = vld [vmem:[%s4591_s4 + $0x2c0] sm:$0xff] }
  0x8d   :  { %v3840_v19 = vpop.permute.xlu0 %229 }
  0x8e   :  { %1353 = vperm.xlu0 %3264, %v2664_v54   ;;  %v3845_v21 = vpop.permute.xlu1 %234  ;;  %v2783_v54 = vld [vmem:[%s4591_s4 + $0x2c8] sm:$0xff] }
  0x8f   :  { %1358 = vperm.xlu1 %3265, %v2665_v55  }
  0x91   :  { %v3853_v24 = vpop.permute.xlu0 %319 }
  0x92   :  { %1443 = vperm.xlu0 %3264, %v2682_v56   ;;  %v3855_v25 = vpop.permute.xlu1 %324 }
  0x93   :  { %1448 = vperm.xlu1 %3265, %v2683_v57   ;;  %v2766_v57 = vld [vmem:[%s4591_s4 + $0x240] sm:$0xff] }
  0x95   :  { %v3866_v29 = vpop.permute.xlu0 %239 }
  0x96   :  { %1363 = vperm.xlu0 %3264, %v2666_v58   ;;  %v3871_v31 = vpop.permute.xlu1 %244  ;;  %v2767_v58 = vld [vmem:[%s4591_s4 + $0x248] sm:$0xff] }
  0x97   :  { %1368 = vperm.xlu1 %3265, %v2667_v59   ;;  %v2784_v59 = vld [vmem:[%s4591_s4 + $0x2d0] sm:$0xff] }
  0x99   :  { %v3882_v35 = vpop.permute.xlu0 %329 }
  0x9a   :  { %1453 = vperm.xlu0 %3264, %v2684_v60   ;;  %v3884_v36 = vpop.permute.xlu1 %334 }
  0x9b   :  { %1458 = vperm.xlu1 %3265, %v2685_v61   ;;  %v2785_v61 = vld [vmem:[%s4591_s4 + $0x2d8] sm:$0xff] }
  0x9d   :  { %v3895_v40 = vpop.permute.xlu0 %249 }
  0x9e   :  { %1373 = vperm.xlu0 %3264, %v2668_v62   ;;  %v3900_v42 = vpop.permute.xlu1 %254 }
  0x9f   :  { %1378 = vperm.xlu1 %3265, %v2669_v63   ;;  %v2768_v63 = vld [vmem:[%s4591_s4 + $0x250] sm:$0xff] }
  0xa1   :  { %v3908_v45 = vpop.permute.xlu0 %339 }
  0xa2   :  { %1463 = vperm.xlu0 %3264, %v2686_v0   ;;  %v3910_v46 = vpop.permute.xlu1 %344  ;;  %v2769_v0 = vld [vmem:[%s4591_s4 + $0x258] sm:$0xff] }
  0xa3   :  { %1468 = vperm.xlu1 %3265, %v2687_v1  }
  0xa5   :  { %v3921_v50 = vpop.permute.xlu0 %259 }
  0xa6   :  { %1383 = vperm.xlu0 %3264, %v2670_v2   ;;  %v3926_v52 = vpop.permute.xlu1 %264 }
  0xa7   :  { %1388 = vperm.xlu1 %3265, %v2671_v3   ;;  %v2786_v3 = vld [vmem:[%s4591_s4 + $0x2e0] sm:$0xff] }
  0xa9   :  { %v3934_v55 = vpop.permute.xlu0 %349 }
  0xaa   :  { %1473 = vperm.xlu0 %3264, %v2688_v6   ;;  %v3936_v56 = vpop.permute.xlu1 %354  ;;  %v2787_v6 = vld [vmem:[%s4591_s4 + $0x2e8] sm:$0xff] }
  0xab   :  { %1478 = vperm.xlu1 %3265, %v2689_v7   ;;  %v2770_v7 = vld [vmem:[%s4591_s4 + $0x260] sm:$0xff] }
  0xad   :  { %v3947_v60 = vpop.permute.xlu0 %269 }
  0xae   :  { %1393 = vperm.xlu0 %3264, %v2672_v8   ;;  %v3952_v62 = vpop.permute.xlu1 %274 }
  0xaf   :  { %1398 = vperm.xlu1 %3265, %v2673_v10   ;;  %v2771_v10 = vld [vmem:[%s4591_s4 + $0x268] sm:$0xff] }
  0xb1   :  { %v3960_v1 = vpop.permute.xlu0 %359 }
  0xb2   :  { %1483 = vperm.xlu0 %3264, %v2690_v12   ;;  %v3962_v2 = vpop.permute.xlu1 %364 }
  0xb3   :  { %1488 = vperm.xlu1 %3265, %v2691_v13   ;;  %v2788_v13 = vld [vmem:[%s4591_s4 + $0x2f0] sm:$0xff] }
  0xb5   :  { %v3973_v8 = vpop.permute.xlu0 %279 }
  0xb6   :  { %1403 = vperm.xlu0 %3264, %v2674_v16   ;;  %v3978_v12 = vpop.permute.xlu1 %284  ;;  %v2789_v16 = vld [vmem:[%s4591_s4 + $0x2f8] sm:$0xff] }
  0xb7   :  { %1408 = vperm.xlu1 %3265, %v2675_v17  }
  0xb9   :  { %v3986_v17 = vpop.permute.xlu0 %369 }
  0xba   :  { %1493 = vperm.xlu0 %3264, %v2692_v18   ;;  %v3988_v18 = vpop.permute.xlu1 %374 }
  0xbb   :  { %1498 = vperm.xlu1 %3265, %v2693_v20   ;;  %v2772_v20 = vld [vmem:[%s4591_s4 + $0x270] sm:$0xff] }
  0xbe   :  { %1413 = vperm.xlu0 %3264, %v2676_v22   ;;  %v2773_v22 = vld [vmem:[%s4591_s4 + $0x278] sm:$0xff] }
  0xbf   :  { %1418 = vperm.xlu1 %3265, %v2677_v23   ;;  %v2469_v23 = vld [vmem:[%s4593_s6] sm:$0xff] }
  0xc2   :  { %2018 = vperm.xlu0 %3264, %v2774_v26   ;;  %v290_v26 = vpop.permute.xlu0 %289 }
  0xc3   :  { %2023 = vperm.xlu1 %3265, %v2775_v27   ;;  %v2470_v27 = vld [vmem:[%s4593_s6 + $0x8] sm:$0xff] }
  0xc6   :  { %1938 = vperm.xlu0 %3264, %v2758_v28   ;;  %v295_v28 = vpop.permute.xlu1 %294 }
  0xc7   :  { %1943 = vperm.xlu1 %3265, %v2759_v30  }
  0xca   :  { %2028 = vperm.xlu0 %3264, %v2776_v32  }
  0xcb   :  { %2033 = vperm.xlu1 %3265, %v2777_v33  }
  0xce   :  { %1948 = vperm.xlu0 %3264, %v2760_v37  }
  0xcf   :  { %1953 = vperm.xlu1 %3265, %v2761_v38   ;;  %v2471_v38 = vld [vmem:[%s4593_s6 + $0x10] sm:$0xff] }
  0xd2   :  { %2038 = vperm.xlu0 %3264, %v2778_v39  }
  0xd3   :  { %2043 = vperm.xlu1 %3265, %v2779_v41  }
  0xd6   :  { %1958 = vperm.xlu0 %3264, %v2762_v43   ;;  %v2472_v43 = vld [vmem:[%s4593_s6 + $0x18] sm:$0xff] }
  0xd7   :  { %1963 = vperm.xlu1 %3265, %v2763_v44  }
  0xda   :  { %2048 = vperm.xlu0 %3264, %v2780_v47  }
  0xdb   :  { %2053 = vperm.xlu1 %3265, %v2781_v48  }
  0xde   :  { %1968 = vperm.xlu0 %3264, %v2764_v49  }
  0xdf   :  { %1973 = vperm.xlu1 %3265, %v2765_v51  }
  0xe2   :  { %2058 = vperm.xlu0 %3264, %v2782_v53  }
  0xe3   :  { %2063 = vperm.xlu1 %3265, %v2783_v54  }
  0xe6   :  { %1978 = vperm.xlu0 %3264, %v2766_v57  }
  0xe7   :  { %1983 = vperm.xlu1 %3265, %v2767_v58  }
  0xea   :  { %2068 = vperm.xlu0 %3264, %v2784_v59  }
  0xeb   :  { %2073 = vperm.xlu1 %3265, %v2785_v61  }
  0xee   :  { %1988 = vperm.xlu0 %3264, %v2768_v63  }
  0xef   :  { %1993 = vperm.xlu1 %3265, %v2769_v0  }
  0xf2   :  { %2078 = vperm.xlu0 %3264, %v2786_v3  }
  0xf3   :  { %2083 = vperm.xlu1 %3265, %v2787_v6  }
  0xf6   :  { %1998 = vperm.xlu0 %3264, %v2770_v7  }
  0xf7   :  { %2003 = vperm.xlu1 %3265, %v2771_v10  }
  0xfa   :  { %2088 = vperm.xlu0 %3264, %v2788_v13  }
  0xfb   :  { %2093 = vperm.xlu1 %3265, %v2789_v16  }
  0xfe   :  { %2008 = vperm.xlu0 %3264, %v2772_v20  }
  0xff   :  { %2013 = vperm.xlu1 %3265, %v2773_v22  }
 0x102   :  { %v3232_v30 = vpop.f32.mrb[0].mxu0  ;;  %2475 = vperm.xlu0 %3264, %v2469_v23  }
 0x103   :  { %v516_v32 = vadd.f32 %v3232_v30, %v3840_v19  ;;  %v507_v33 = vpop.f32.mrb[1].mxu0  ;;  %2480 = vperm.xlu1 %3265, %v2470_v27   ;;  %v4012_v19 = vpop.permute.xlu0 %828 }
 0x104   :  { %v508_v34 = vadd.f32 %v507_v33, %v3803_v5  ;;  %v3233_v37 = vpop.f32.mrb[2].mxu0  ;;  %v4014_v5 = vpop.permute.xlu1 %833 }
 0x105   :  { %v519_v39 = vadd.f32 %v3233_v37, %v3845_v21  ;;  %v510_v41 = vpop.f32.mrb[3].mxu0  ;;  %v636_v47 = vmax.f32 %v516_v32, 0.0 }
 0x106   :  { %v511_v44 = vadd.f32 %v510_v41, %v3819_v11  ;;  %2485 = vperm.xlu0 %3264, %v2471_v38   ;;  %v634_v49 = vmax.f32 %v508_v34, 0.0 }
 0x107   :  { %v637_v48 = vmax.f32 %v519_v39, 0.0  ;;  %2490 = vperm.xlu1 %3265, %v2472_v43  }
 0x108   :  { %v635_v51 = vmax.f32 %v511_v44, 0.0 }
 0x109   :  { %v4016_v53 = vpack.c.bf16 %v637_v48, %v636_v47 }
 0x10a   :  { %v3236_v21 = vpop.f32.mrb[4].mxu0  ;;  %v4018_v54 = vpack.c.bf16 %v635_v51, %v634_v49 }
 0x10b   :  { %v532_v57 = vadd.f32 %v3236_v21, %v3895_v40  ;;  %v523_v58 = vpop.f32.mrb[5].mxu0 }
 0x10c   :  { %v524_v11 = vadd.f32 %v523_v58, %v3866_v29  ;;  %v3237_v59 = vpop.f32.mrb[6].mxu0 }
 0x10d   :  { %v535_v61 = vadd.f32 %v3237_v59, %v3900_v42  ;;  %v526_v63 = vpop.f32.mrb[7].mxu0  ;;  %v640_v3 = vmax.f32 %v532_v57, 0.0 }
 0x10e   :  { %v527_v0 = vadd.f32 %v526_v63, %v3871_v31  ;;  %v638_v7 = vmax.f32 %v524_v11, 0.0 }
 0x10f   :  { %v641_v6 = vmax.f32 %v535_v61, 0.0 }
 0x110   :  { %v639_v10 = vmax.f32 %v527_v0, 0.0 }
 0x111   :  { %v4024_v13 = vpack.c.bf16 %v641_v6, %v640_v3 }
 0x112   :  { %v4026_v16 = vpack.c.bf16 %v639_v10, %v638_v7  ;;  %v3240_v20 = vpop.f32.mrb[8].mxu0 }
 0x113   :  { %v548_v40 = vadd.f32 %v3240_v20, %v3947_v60  ;;  %v539_v22 = vpop.f32.mrb[9].mxu0 }
 0x114   :  { %v540_v29 = vadd.f32 %v539_v22, %v3921_v50  ;;  %v3241_v23 = vpop.f32.mrb[10].mxu0 }
 0x115   :  { %v551_v42 = vadd.f32 %v3241_v23, %v3952_v62  ;;  %v542_v27 = vpop.f32.mrb[11].mxu0  ;;  %v644_v30 = vmax.f32 %v548_v40, 0.0 }
 0x116   :  { %v543_v31 = vadd.f32 %v542_v27, %v3926_v52  ;;  %v642_v33 = vmax.f32 %v540_v29, 0.0 }
 0x117   :  { %v645_v32 = vmax.f32 %v551_v42, 0.0 }
 0x118   :  { %v643_v34 = vmax.f32 %v543_v31, 0.0 }
 0x119   :  { %v4032_v37 = vpack.c.bf16 %v645_v32, %v644_v30 }
 0x11a   :  { %v4034_v38 = vpack.c.bf16 %v643_v34, %v642_v33  ;;  %v3244_v39 = vpop.f32.mrb[12].mxu0 }
 0x11b   :  { %v564_v41 = vadd.f32 %v3244_v39, %v290_v26  ;;  %v555_v60 = vpop.f32.mrb[13].mxu0 }
 0x11c   :  { %v556_v43 = vadd.f32 %v555_v60, %v3973_v8  ;;  %v3245_v50 = vpop.f32.mrb[14].mxu0 }
 0x11d   :  { %v567_v44 = vadd.f32 %v3245_v50, %v295_v28  ;;  %v558_v47 = vpop.f32.mrb[15].mxu0  ;;  %v648_v48 = vmax.f32 %v564_v41, 0.0 }
 0x11e   :  { %v559_v62 = vadd.f32 %v558_v47, %v3978_v12  ;;  %v646_v49 = vmax.f32 %v556_v43, 0.0 }
 0x11f   :  { %v649_v52 = vmax.f32 %v567_v44, 0.0 }
 0x120   :  { %v647_v51 = vmax.f32 %v559_v62, 0.0 }
 0x121   :  { %v4038_v21 = vpack.c.bf16 %v649_v52, %v648_v48 }
 0x122   :  { %v4040_v57 = vpack.c.bf16 %v647_v51, %v646_v49  ;;  %v3248_v58 = vpop.f32.mrb[16].mxu0 }
 0x123   :  { %v580_v11 = vadd.f32 %v3248_v58, %v3827_v14  ;;  %v571_v26 = vpop.f32.mrb[17].mxu0 }
 0x124   :  { %v572_v59 = vadd.f32 %v571_v26, %v3801_v4  ;;  %v3249_v8 = vpop.f32.mrb[18].mxu0  ;;  %v3296_v26 = vld [vmem:[%s4590_s3 + $0x40] ss:$8 sps:$4 sm:$0xff]  }
 0x125   :  { %v583_v28 = vadd.f32 %v3249_v8, %v3829_v15  ;;  %v574_v61 = vpop.f32.mrb[19].mxu0  ;;  %v652_v63 = vmax.f32 %v580_v11, 0.0  ;;  %v3294_v11 = vld [vmem:[%s4590_s3 + $0x44] ss:$8 sps:$4 sm:$0xff]   ;;  %v3299_v8 = vld [vmem:[%s4590_s3 + $0x50] ss:$8 sps:$4 sm:$0xff]  }
 0x126   :  { %v575_v12 = vadd.f32 %v574_v61, %v3814_v9  ;;  %v650_v3 = vmax.f32 %v572_v59, 0.0  ;;  %v3297_v59 = vld [vmem:[%s4590_s3 + $0x54] ss:$8 sps:$4 sm:$0xff]   ;;  %v3302_v61 = vld [vmem:[%s4590_s3 + $0x60] ss:$8 sps:$4 sm:$0xff]  }
 0x127   :  { %v653_v0 = vmax.f32 %v583_v28, 0.0  ;;  %v3300_v28 = vld [vmem:[%s4590_s3 + $0x64] ss:$8 sps:$4 sm:$0xff]  }
 0x128   :  { %v651_v6 = vmax.f32 %v575_v12, 0.0  ;;  %v3303_v12 = vld [vmem:[%s4590_s3 + $0x74] ss:$8 sps:$4 sm:$0xff]  }
 0x129   :  { %v707_v7 = vpack.c.bf16 %v653_v0, %v652_v63  ;;  %v3305_v63 = vld [vmem:[%s4590_s3 + $0x70] ss:$8 sps:$4 sm:$0xff]   ;;  %v3306_v0 = vld [vmem:[%s4590_s3 + $0x84] ss:$8 sps:$4 sm:$0xff]  }
 0x12a   :  { %v3252_v10 = vpop.f32.mrb[20].mxu0  ;;  %v706_v20 = vpack.c.bf16 %v651_v6, %v650_v3  ;;  %v3308_v3 = vld [vmem:[%s4590_s3 + $0x80] ss:$8 sps:$4 sm:$0xff]   ;;  %v3309_v6 = vld [vmem:[%s4590_s3 + $0x94] ss:$8 sps:$4 sm:$0xff]  }
 0x12b   :  { %v596_v40 = vadd.f32 %v3252_v10, %v3882_v35  ;;  %v587_v22 = vpop.f32.mrb[21].mxu0  ;;  %v3312_v10 = vld [vmem:[%s4590_s3 + $0xa4] ss:$8 sps:$4 sm:$0xff]  }
 0x12c   :  { %v588_v14 = vadd.f32 %v587_v22, %v3853_v24  ;;  %v3253_v29 = vpop.f32.mrb[22].mxu0  ;;  %2850 = vmatprep.subr.bf16.mxu1 %v706_v20  ;;  %v3314_v20 = vld [vmem:[%s4590_s3 + $0xa0] ss:$8 sps:$4 sm:$0xff]   ;;  %v3317_v22 = vld [vmem:[%s4590_s3 + $0xb0] ss:$8 sps:$4 sm:$0xff]  }
 0x12d   :  { %v599_v4 = vadd.f32 %v3253_v29, %v3884_v36  ;;  %v590_v15 = vpop.f32.mrb[23].mxu0  ;;  %2851 = vmatpush3.bf16.msra.mxu1 %v4018_v54  ;;  %v656_v23 = vmax.f32 %v596_v40, 0.0  ;;  %v3315_v40 = vld [vmem:[%s4590_s3 + $0xb4] ss:$8 sps:$4 sm:$0xff]   ;;  %v3320_v29 = vld [vmem:[%s4590_s3 + $0xc0] ss:$8 sps:$4 sm:$0xff]  }
 0x12e   :  { %v591_v9 = vadd.f32 %v590_v15, %v3855_v25  ;;  %2852 = vmatprep.subr.bf16.mxu1 %v707_v7  ;;  %v654_v27 = vmax.f32 %v588_v14, 0.0  ;;  %v3311_v7 = vld [vmem:[%s4590_s3 + $0x90] ss:$8 sps:$4 sm:$0xff]   ;;  %v3318_v14 = vld [vmem:[%s4590_s3 + $0xc4] ss:$8 sps:$4 sm:$0xff]  }
 0x12f   :  { %v657_v42 = vmax.f32 %v599_v4, 0.0  ;;  %v3321_v4 = vld [vmem:[%s4590_s3 + $0xd4] ss:$8 sps:$4 sm:$0xff]   ;;  %v3323_v15 = vld [vmem:[%s4590_s3 + $0xd0] ss:$8 sps:$4 sm:$0xff]  }
 0x130   :  { %v655_v31 = vmax.f32 %v591_v9, 0.0  ;;  %v3324_v9 = vld [vmem:[%s4590_s3 + $0xe4] ss:$8 sps:$4 sm:$0xff]  }
 0x131   :  { %v709_v30 = vpack.c.bf16 %v657_v42, %v656_v23  ;;  %2853 = vmatpush3.bf16.msra.mxu1 %v4016_v53  ;;  %v3326_v23 = vld [vmem:[%s4590_s3 + $0xe0] ss:$8 sps:$4 sm:$0xff]   ;;  %v3327_v42 = vld [vmem:[%s4590_s3 + $0xf4] ss:$8 sps:$4 sm:$0xff]  }
 0x132   :  { %v708_v35 = vpack.c.bf16 %v655_v31, %v654_v27  ;;  %v3256_v32 = vpop.f32.mrb[24].mxu0  ;;  %v3329_v27 = vld [vmem:[%s4590_s3 + $0xf0] ss:$8 sps:$4 sm:$0xff]   ;;  %v749_v31 = vpop.permute.xlu0 %748 }
 0x133   :  { %v612_v24 = vadd.f32 %v3256_v32, %v3934_v55  ;;  %v603_v33 = vpop.f32.mrb[25].mxu0 }
 0x134   :  { %v604_v36 = vadd.f32 %v603_v33, %v3908_v45  ;;  %v3257_v34 = vpop.f32.mrb[26].mxu0  ;;  %2854 = vmatprep.subr.bf16.mxu1 %v708_v35 }
 0x135   :  { %v615_v54 = vadd.f32 %v3257_v34, %v3936_v56  ;;  %v606_v25 = vpop.f32.mrb[27].mxu0  ;;  %2855 = vmatpush3.bf16.msra.mxu1 %v4026_v16  ;;  %v660_v41 = vmax.f32 %v612_v24, 0.0 }
 0x136   :  { %v607_v39 = vadd.f32 %v606_v25, %v3910_v46  ;;  %2856 = vmatprep.subr.bf16.mxu1 %v709_v30  ;;  %v658_v53 = vmax.f32 %v604_v36, 0.0  ;;  %v754_v30 = vpop.permute.xlu1 %753  ;;  %v4159_v35 = vpop.permute.xlu0 %838 }
 0x137   :  { %v661_v60 = vmax.f32 %v615_v54, 0.0 }
 0x138   :  { %v659_v43 = vmax.f32 %v607_v39, 0.0 }
 0x139   :  { %v711_v50 = vpack.c.bf16 %v661_v60, %v660_v41  ;;  %2857 = vmatpush3.bf16.msra.mxu1 %v4024_v13 }
 0x13a   :  { %v710_v55 = vpack.c.bf16 %v659_v43, %v658_v53  ;;  %v3260_v44 = vpop.f32.mrb[28].mxu0  ;;  %v4161_v32 = vpop.permute.xlu1 %843 }
 0x13b   :  { %v628_v45 = vadd.f32 %v3260_v44, %v3986_v17  ;;  %v619_v47 = vpop.f32.mrb[29].mxu0  ;;  %v759_v24 = vpop.permute.xlu0 %758 }
 0x13c   :  { %v620_v56 = vadd.f32 %v619_v47, %v3960_v1  ;;  %v3261_v62 = vpop.f32.mrb[30].mxu0  ;;  %2858 = vmatprep.subr.bf16.mxu1 %v710_v55  ;;  %v3282_v1 = vld [vmem:[%s4590_s3] ss:$8 sps:$4 sm:$0xff]  }
 0x13d   :  { %v631_v16 = vadd.f32 %v3261_v62, %v3988_v18  ;;  %v622_v46 = vpop.f32.mrb[31].mxu0  ;;  %2859 = vmatpush3.bf16.msra.mxu1 %v4034_v38  ;;  %v664_v52 = vmax.f32 %v628_v45, 0.0  ;;  %v3287_v18 = vld [vmem:[%s4590_s3 + $0x10] ss:$8 sps:$4 sm:$0xff]   ;;  %v3290_v38 = vld [vmem:[%s4590_s3 + $0x20] ss:$8 sps:$4 sm:$0xff]  }
 0x13e   :  { %v623_v48 = vadd.f32 %v622_v46, %v3962_v2  ;;  %2860 = vmatprep.subr.bf16.mxu1 %v711_v50  ;;  %v662_v13 = vmax.f32 %v620_v56, 0.0  ;;  %v3285_v2 = vld [vmem:[%s4590_s3 + $0x14] ss:$8 sps:$4 sm:$0xff]   ;;  %v764_v33 = vpop.permute.xlu1 %763  ;;  %v3332_v45 = vld [vmem:[%s4590_s3 + $0x104] ss:$8 sps:$4 sm:$0xff]  }
 0x13f   :  { %v665_v49 = vmax.f32 %v631_v16, 0.0  ;;  %v4163_v36 = vpop.permute.xlu0 %848  ;;  %1693 = vmatprep.mubr.bf16.mxu0 %v3332_v45 }
 0x140   :  { %v663_v51 = vmax.f32 %v623_v48, 0.0 }
 0x141   :  { %v713_v58 = vpack.c.bf16 %v665_v49, %v664_v52  ;;  %2861 = vmatpush3.bf16.msra.mxu1 %v4032_v37  ;;  %v3288_v37 = vld [vmem:[%s4590_s3 + $0x24] ss:$8 sps:$4 sm:$0xff]  }
 0x142   :  { %v712_v17 = vpack.c.bf16 %v663_v51, %v662_v13  ;;  %v4165_v34 = vpop.permute.xlu1 %853 }
 0x143   :  { %v769_v54 = vpop.permute.xlu0 %768 }
 0x144   :  { %2862 = vmatprep.subr.bf16.mxu1 %v712_v17 }
 0x145   :  { %2863 = vmatpush3.bf16.msra.mxu1 %v4040_v57  ;;  %v3293_v57 = vld [vmem:[%s4590_s3 + $0x30] ss:$8 sps:$4 sm:$0xff]  }
 0x146   :  { %2864 = vmatprep.subr.bf16.mxu1 %v713_v58  ;;  %v774_v39 = vpop.permute.xlu1 %773 }
 0x147   :  { %v4167_v44 = vpop.permute.xlu0 %858 }
 0x149   :  { %2865 = vmatpush3.bf16.msra.mxu1 %v4038_v21  ;;  %v3291_v21 = vld [vmem:[%s4590_s3 + $0x34] ss:$8 sps:$4 sm:$0xff]  }
 0x14a   :  { %v4172_v56 = vpop.permute.xlu1 %863 }
 0x14b   :  { %v779_v51 = vpop.permute.xlu0 %778 }
 0x14c   :  { %1099 = vmatmul.mubr.bf16.vlgmr.msra.gmra.mrb[0].mxu1 %v3282_v1 }
 0x14d   :  { %1106 = vmatprep.mubr.bf16.mxu1 %v3285_v2 }
 0x14e   :  { %v784_v2 = vpop.permute.xlu1 %783 }
 0x154   :  { %1107 = vmatmul.mubr.bf16.gmra.mrb[4].mxu1 %v3287_v18 }
 0x155   :  { %1114 = vmatprep.mubr.bf16.mxu1 %v3288_v37 }
 0x15c   :  { %1115 = vmatmul.mubr.bf16.gmra.mrb[8].mxu1 %v3290_v38 }
 0x15d   :  { %1122 = vmatprep.mubr.bf16.mxu1 %v3291_v21 }
 0x164   :  { %1123 = vmatmul.mubr.bf16.gmra.mrb[12].mxu1 %v3293_v57  ;;  %v4176_v57 = vpop.permute.xlu0 %868 }
 0x165   :  { %1130 = vmatprep.mubr.bf16.mxu1 %v3294_v11 }
 0x16c   :  { %1131 = vmatmul.mubr.bf16.gmra.mrb[16].mxu1 %v3296_v26 }
 0x16d   :  { %1138 = vmatprep.mubr.bf16.mxu1 %v3297_v59 }
 0x174   :  { %1139 = vmatmul.mubr.bf16.gmra.mrb[20].mxu1 %v3299_v8 }
 0x175   :  { %1146 = vmatprep.mubr.bf16.mxu1 %v3300_v28  ;;  %v4180_v28 = vpop.permute.xlu1 %873 }
 0x17c   :  { %1147 = vmatmul.mubr.bf16.gmra.mrb[24].mxu1 %v3302_v61 }
 0x17d   :  { %1154 = vmatprep.mubr.bf16.mxu1 %v3303_v12 }
 0x184   :  { %1155 = vmatmul.mubr.bf16.gmra.mrb[28].mxu1 %v3305_v63 }
 0x185   :  { %1162 = vmatprep.mubr.bf16.mxu1 %v3306_v0 }
 0x18c   :  { %1163 = vmatmul.mubr.bf16.gmra.mrb[32].mxu1 %v3308_v3  ;;  %v789_v3 = vpop.permute.xlu0 %788 }
 0x18d   :  { %1170 = vmatprep.mubr.bf16.mxu1 %v3309_v6 }
 0x194   :  { %1171 = vmatmul.mubr.bf16.gmra.mrb[36].mxu1 %v3311_v7 }
 0x195   :  { %1178 = vmatprep.mubr.bf16.mxu1 %v3312_v10 }
 0x19c   :  { %1179 = vmatmul.mubr.bf16.gmra.mrb[40].mxu1 %v3314_v20  ;;  %v794_v20 = vpop.permute.xlu1 %793 }
 0x19d   :  { %1186 = vmatprep.mubr.bf16.mxu1 %v3315_v40 }
 0x1a4   :  { %1187 = vmatmul.mubr.bf16.gmra.mrb[44].mxu1 %v3317_v22 }
 0x1a5   :  { %1194 = vmatprep.mubr.bf16.mxu1 %v3318_v14 }
 0x1ac   :  { %1195 = vmatmul.mubr.bf16.gmra.mrb[48].mxu1 %v3320_v29 }
 0x1ad   :  { %1202 = vmatprep.mubr.bf16.mxu1 %v3321_v4 }
 0x1b4   :  { %1203 = vmatmul.mubr.bf16.gmra.mrb[52].mxu1 %v3323_v15 }
 0x1b5   :  { %1210 = vmatprep.mubr.bf16.mxu1 %v3324_v9 }
 0x1bc   :  { %1211 = vmatmul.mubr.bf16.gmra.mrb[56].mxu1 %v3326_v23  ;;  %v4184_v23 = vpop.permute.xlu0 %878 }
 0x1bd   :  { %1218 = vmatprep.mubr.bf16.mxu1 %v3327_v42 }
 0x1c4   :  { %1219 = vmatmul.mubr.bf16.gmra.mrb[60].mxu1 %v3329_v27  ;;  %v4186_v27 = vpop.permute.xlu1 %883 }
 0x21f   :  { %v2866_v25 = vpop.f32.mrb[0].mxu1 }
 0x220   :  { %v2867_v41 = vpop.f32.mrb[1].mxu1 }
 0x221   :  { %v2868_v60 = vadd.f32 %v2867_v41, %v2866_v25  ;;  %v2869_v53 = vpop.f32.mrb[2].mxu1  ;;  %v799_v41 = vpop.permute.xlu0 %798 }
 0x222   :  { %v2870_v43 = vpop.f32.mrb[3].mxu1 }
 0x223   :  { %v1101_v50 = vadd.f32 %v2868_v60, %v749_v31  ;;  %v2871_v55 = vadd.f32 %v2870_v43, %v2869_v53 }
 0x225   :  { %v1104_v47 = vadd.f32 %v2871_v55, %v754_v30  ;;  %v1227_v62 = vmax.f32 %v1101_v50, 0.0  ;;  %v804_v50 = vpop.permute.xlu1 %803 }
 0x227   :  { %v1228_v16 = vmax.f32 %v1104_v47, 0.0  ;;  %v2872_v46 = vpop.f32.mrb[4].mxu1 }
 0x228   :  { %v2873_v48 = vpop.f32.mrb[5].mxu1 }
 0x229   :  { %v4174_v52 = vpack.c.bf16 %v1228_v16, %v1227_v62  ;;  %v2874_v49 = vadd.f32 %v2873_v48, %v2872_v46  ;;  %v2875_v13 = vpop.f32.mrb[6].mxu1  ;;  %v4190_v16 = vpop.permute.xlu0 %888 }
 0x22a   :  { %v2876_v58 = vpop.f32.mrb[7].mxu1 }
 0x22b   :  { %v1109_v17 = vadd.f32 %v2874_v49, %v759_v24  ;;  %v2877_v1 = vadd.f32 %v2876_v58, %v2875_v13 }
 0x22d   :  { %v1112_v18 = vadd.f32 %v2877_v1, %v764_v33  ;;  %v1229_v37 = vmax.f32 %v1109_v17, 0.0 }
 0x22f   :  { %v1230_v38 = vmax.f32 %v1112_v18, 0.0  ;;  %v2878_v21 = vpop.f32.mrb[8].mxu1  ;;  %v809_v18 = vpop.permute.xlu0 %808 }
 0x230   :  { %v2879_v11 = vpop.f32.mrb[9].mxu1 }
 0x231   :  { %v4178_v26 = vpack.c.bf16 %v1230_v38, %v1229_v37  ;;  %v2880_v59 = vadd.f32 %v2879_v11, %v2878_v21  ;;  %v2881_v8 = vpop.f32.mrb[10].mxu1 }
 0x232   :  { %v2882_v61 = vpop.f32.mrb[11].mxu1 }
 0x233   :  { %v1117_v12 = vadd.f32 %v2880_v59, %v769_v54  ;;  %v2883_v63 = vadd.f32 %v2882_v61, %v2881_v8 }
 0x235   :  { %v1120_v0 = vadd.f32 %v2883_v63, %v774_v39  ;;  %v1231_v6 = vmax.f32 %v1117_v12, 0.0 }
 0x237   :  { %v1232_v7 = vmax.f32 %v1120_v0, 0.0  ;;  %v2884_v10 = vpop.f32.mrb[12].mxu1 }
 0x238   :  { %v2885_v40 = vpop.f32.mrb[13].mxu1 }
 0x239   :  { %v4182_v22 = vpack.c.bf16 %v1232_v7, %v1231_v6  ;;  %v2886_v14 = vadd.f32 %v2885_v40, %v2884_v10  ;;  %v2887_v29 = vpop.f32.mrb[14].mxu1  ;;  %v4198_v6 = vpop.permute.xlu0 %898 }
 0x23a   :  { %v2888_v4 = vpop.f32.mrb[15].mxu1 }
 0x23b   :  { %v1125_v15 = vadd.f32 %v2886_v14, %v779_v51  ;;  %v2889_v9 = vadd.f32 %v2888_v4, %v2887_v29  ;;  %v4194_v51 = vpop.permute.xlu1 %893 }
 0x23d   :  { %v1128_v42 = vadd.f32 %v2889_v9, %v784_v2  ;;  %v1233_v31 = vmax.f32 %v1125_v15, 0.0 }
 0x23f   :  { %v1234_v30 = vmax.f32 %v1128_v42, 0.0  ;;  %v2890_v24 = vpop.f32.mrb[16].mxu1  ;;  %v814_v11 = vpop.permute.xlu1 %813 }
 0x240   :  { %v2891_v33 = vpop.f32.mrb[17].mxu1  ;;  %v819_v42 = vpop.permute.xlu0 %818 }
 0x241   :  { %v4188_v54 = vpack.c.bf16 %v1234_v30, %v1233_v31  ;;  %v2892_v25 = vadd.f32 %v2891_v33, %v2890_v24  ;;  %v2893_v39 = vpop.f32.mrb[18].mxu1 }
 0x242   :  { %v2894_v60 = vpop.f32.mrb[19].mxu1 }
 0x243   :  { %v1133_v53 = vadd.f32 %v2892_v25, %v789_v3  ;;  %v2895_v43 = vadd.f32 %v2894_v60, %v2893_v39  ;;  %v4200_v10 = vpop.permute.xlu1 %903 }
 0x245   :  { %v1136_v55 = vadd.f32 %v2895_v43, %v794_v20  ;;  %v1235_v45 = vmax.f32 %v1133_v53, 0.0 }
 0x247   :  { %v1236_v47 = vmax.f32 %v1136_v55, 0.0  ;;  %v2896_v62 = vpop.f32.mrb[20].mxu1  ;;  %v824_v33 = vpop.permute.xlu1 %823 }
 0x248   :  { %v2897_v46 = vpop.f32.mrb[21].mxu1 }
 0x249   :  { %v4192_v48 = vpack.c.bf16 %v1236_v47, %v1235_v45  ;;  %v2898_v49 = vadd.f32 %v2897_v46, %v2896_v62  ;;  %v2899_v13 = vpop.f32.mrb[22].mxu1 }
 0x24a   :  { %v2900_v58 = vpop.f32.mrb[23].mxu1 }
 0x24b   :  { %v1141_v17 = vadd.f32 %v2898_v49, %v799_v41  ;;  %v2901_v1 = vadd.f32 %v2900_v58, %v2899_v13 }
 0x24d   :  { %v1144_v2 = vadd.f32 %v2901_v1, %v804_v50  ;;  %v1237_v37 = vmax.f32 %v1141_v17, 0.0 }
 0x24f   :  { %v1238_v38 = vmax.f32 %v1144_v2, 0.0  ;;  %v2902_v21 = vpop.f32.mrb[24].mxu1 }
 0x250   :  { %v2903_v59 = vpop.f32.mrb[25].mxu1 }
 0x251   :  { %v4196_v8 = vpack.c.bf16 %v1238_v38, %v1237_v37  ;;  %v2904_v61 = vadd.f32 %v2903_v59, %v2902_v21  ;;  %v2905_v12 = vpop.f32.mrb[26].mxu1 }
 0x252   :  { %v2906_v63 = vpop.f32.mrb[27].mxu1 }
 0x253   :  { %v1149_v0 = vadd.f32 %v2904_v61, %v809_v18  ;;  %v2907_v3 = vadd.f32 %v2906_v63, %v2905_v12 }
 0x255   :  { %v1152_v7 = vadd.f32 %v2907_v3, %v814_v11  ;;  %v1239_v20 = vmax.f32 %v1149_v0, 0.0 }
 0x257   :  { %v1240_v40 = vmax.f32 %v1152_v7, 0.0  ;;  %v2908_v14 = vpop.f32.mrb[28].mxu1 }
 0x258   :  { %v2909_v29 = vpop.f32.mrb[29].mxu1 }
 0x259   :  { %v4202_v4 = vpack.c.bf16 %v1240_v40, %v1239_v20  ;;  %v2910_v15 = vadd.f32 %v2909_v29, %v2908_v14  ;;  %v2911_v9 = vpop.f32.mrb[30].mxu1 }
 0x25a   :  { %v2912_v31 = vpop.f32.mrb[31].mxu1 }
 0x25b   :  { %v1157_v30 = vadd.f32 %v2910_v15, %v819_v42  ;;  %v2913_v24 = vadd.f32 %v2912_v31, %v2911_v9 }
 0x25d   :  { %v1160_v25 = vadd.f32 %v2913_v24, %v824_v33  ;;  %v1241_v39 = vmax.f32 %v1157_v30, 0.0 }
 0x25f   :  { %v1242_v41 = vmax.f32 %v1160_v25, 0.0  ;;  %v2914_v60 = vpop.f32.mrb[32].mxu1 }
 0x260   :  { %v2915_v53 = vpop.f32.mrb[33].mxu1 }
 0x261   :  { %v4204_v43 = vpack.c.bf16 %v1242_v41, %v1241_v39  ;;  %v2916_v50 = vadd.f32 %v2915_v53, %v2914_v60  ;;  %v2917_v55 = vpop.f32.mrb[34].mxu1 }
 0x262   :  { %v2918_v45 = vpop.f32.mrb[35].mxu1 }
 0x263   :  { %v1165_v47 = vadd.f32 %v2916_v50, %v4012_v19  ;;  %v2919_v62 = vadd.f32 %v2918_v45, %v2917_v55 }
 0x265   :  { %v1168_v46 = vadd.f32 %v2919_v62, %v4014_v5  ;;  %v1243_v49 = vmax.f32 %v1165_v47, 0.0 }
 0x267   :  { %v1244_v13 = vmax.f32 %v1168_v46, 0.0  ;;  %v2920_v58 = vpop.f32.mrb[36].mxu1 }
 0x268   :  { %v2921_v17 = vpop.f32.mrb[37].mxu1 }
 0x269   :  { %v2922_v1 = vadd.f32 %v2921_v17, %v2920_v58  ;;  %v2923_v2 = vpop.f32.mrb[38].mxu1  ;;  %v1300_v18 = vpack.c.bf16 %v1244_v13, %v1243_v49 }
 0x26a   :  { %v2924_v37 = vpop.f32.mrb[39].mxu1 }
 0x26b   :  { %v1173_v38 = vadd.f32 %v2922_v1, %v4159_v35  ;;  %v2925_v21 = vadd.f32 %v2924_v37, %v2923_v2  ;;  %2962 = vmatprep.subr.bf16.mxu0 %v1300_v18 }
 0x26c   :  { %2963 = vmatpush3.bf16.msra.mxu0 %v4174_v52 }
 0x26d   :  { %v1176_v11 = vadd.f32 %v2925_v21, %v4161_v32  ;;  %v1245_v19 = vmax.f32 %v1173_v38, 0.0 }
 0x26f   :  { %v1246_v59 = vmax.f32 %v1176_v11, 0.0  ;;  %v2926_v61 = vpop.f32.mrb[40].mxu1 }
 0x270   :  { %v2927_v5 = vpop.f32.mrb[41].mxu1 }
 0x271   :  { %v2928_v12 = vadd.f32 %v2927_v5, %v2926_v61  ;;  %v2929_v63 = vpop.f32.mrb[42].mxu1  ;;  %v1301_v0 = vpack.c.bf16 %v1246_v59, %v1245_v19 }
 0x272   :  { %v2930_v3 = vpop.f32.mrb[43].mxu1 }
 0x273   :  { %v1181_v7 = vadd.f32 %v2928_v12, %v4163_v36  ;;  %v2931_v20 = vadd.f32 %v2930_v3, %v2929_v63  ;;  %2964 = vmatprep.subr.bf16.mxu0 %v1301_v0 }
 0x274   :  { %2965 = vmatpush3.bf16.msra.mxu0 %v4178_v26 }
 0x275   :  { %v1184_v35 = vadd.f32 %v2931_v20, %v4165_v34  ;;  %v1247_v40 = vmax.f32 %v1181_v7, 0.0 }
 0x277   :  { %v1248_v52 = vmax.f32 %v1184_v35, 0.0  ;;  %v2932_v14 = vpop.f32.mrb[44].mxu1  ;;  %v3339_v35 = vld [vmem:[%s4590_s3 + $0x134] ss:$8 sps:$4 sm:$0xff]  }
 0x278   :  { %v2933_v32 = vpop.f32.mrb[45].mxu1 }
 0x279   :  { %v2934_v29 = vadd.f32 %v2933_v32, %v2932_v14  ;;  %v2935_v15 = vpop.f32.mrb[46].mxu1  ;;  %v1302_v9 = vpack.c.bf16 %v1248_v52, %v1247_v40  ;;  %v3341_v40 = vld [vmem:[%s4590_s3 + $0x130] ss:$8 sps:$4 sm:$0xff]   ;;  %v3342_v52 = vld [vmem:[%s4590_s3 + $0x144] ss:$8 sps:$4 sm:$0xff]  }
 0x27a   :  { %v2936_v42 = vpop.f32.mrb[47].mxu1  ;;  %v3344_v14 = vld [vmem:[%s4590_s3 + $0x140] ss:$8 sps:$4 sm:$0xff]   ;;  %v3345_v32 = vld [vmem:[%s4590_s3 + $0x154] ss:$8 sps:$4 sm:$0xff]  }
 0x27b   :  { %v1189_v31 = vadd.f32 %v2934_v29, %v4167_v44  ;;  %v2937_v30 = vadd.f32 %v2936_v42, %v2935_v15  ;;  %2966 = vmatprep.subr.bf16.mxu0 %v1302_v9  ;;  %v3347_v29 = vld [vmem:[%s4590_s3 + $0x150] ss:$8 sps:$4 sm:$0xff]   ;;  %v3348_v15 = vld [vmem:[%s4590_s3 + $0x164] ss:$8 sps:$4 sm:$0xff]   ;;  %v3350_v9 = vld [vmem:[%s4590_s3 + $0x160] ss:$8 sps:$4 sm:$0xff]  }
 0x27c   :  { %2967 = vmatpush3.bf16.msra.mxu0 %v4182_v22  ;;  %v3351_v42 = vld [vmem:[%s4590_s3 + $0x174] ss:$8 sps:$4 sm:$0xff]  }
 0x27d   :  { %v1192_v36 = vadd.f32 %v2937_v30, %v4172_v56  ;;  %v1249_v24 = vmax.f32 %v1189_v31, 0.0  ;;  %v3353_v31 = vld [vmem:[%s4590_s3 + $0x170] ss:$8 sps:$4 sm:$0xff]   ;;  %v3354_v30 = vld [vmem:[%s4590_s3 + $0x184] ss:$8 sps:$4 sm:$0xff]  }
 0x27f   :  { %v1250_v26 = vmax.f32 %v1192_v36, 0.0  ;;  %v2938_v33 = vpop.f32.mrb[48].mxu1  ;;  %v3356_v36 = vld [vmem:[%s4590_s3 + $0x180] ss:$8 sps:$4 sm:$0xff]  }
 0x280   :  { %v2939_v34 = vpop.f32.mrb[49].mxu1 }
 0x281   :  { %v2940_v25 = vadd.f32 %v2939_v34, %v2938_v33  ;;  %v2941_v39 = vpop.f32.mrb[50].mxu1  ;;  %v1303_v41 = vpack.c.bf16 %v1250_v26, %v1249_v24  ;;  %v3357_v24 = vld [vmem:[%s4590_s3 + $0x194] ss:$8 sps:$4 sm:$0xff]   ;;  %v3359_v26 = vld [vmem:[%s4590_s3 + $0x190] ss:$8 sps:$4 sm:$0xff]  }
 0x282   :  { %v2942_v60 = vpop.f32.mrb[51].mxu1  ;;  %v3360_v33 = vld [vmem:[%s4590_s3 + $0x1a4] ss:$8 sps:$4 sm:$0xff]   ;;  %v3362_v34 = vld [vmem:[%s4590_s3 + $0x1a0] ss:$8 sps:$4 sm:$0xff]  }
 0x283   :  { %v1197_v53 = vadd.f32 %v2940_v25, %v4176_v57  ;;  %v2943_v50 = vadd.f32 %v2942_v60, %v2941_v39  ;;  %2968 = vmatprep.subr.bf16.mxu0 %v1303_v41  ;;  %v3363_v25 = vld [vmem:[%s4590_s3 + $0x1b4] ss:$8 sps:$4 sm:$0xff]   ;;  %v3365_v39 = vld [vmem:[%s4590_s3 + $0x1b0] ss:$8 sps:$4 sm:$0xff]   ;;  %v3366_v41 = vld [vmem:[%s4590_s3 + $0x1c4] ss:$8 sps:$4 sm:$0xff]  }
 0x284   :  { %2969 = vmatpush3.bf16.msra.mxu0 %v4188_v54  ;;  %v3368_v60 = vld [vmem:[%s4590_s3 + $0x1c0] ss:$8 sps:$4 sm:$0xff]  }
 0x285   :  { %v1200_v44 = vadd.f32 %v2943_v50, %v4180_v28  ;;  %v1251_v55 = vmax.f32 %v1197_v53, 0.0  ;;  %v3369_v53 = vld [vmem:[%s4590_s3 + $0x1d4] ss:$8 sps:$4 sm:$0xff]   ;;  %v3371_v50 = vld [vmem:[%s4590_s3 + $0x1d0] ss:$8 sps:$4 sm:$0xff]  }
 0x287   :  { %v1252_v22 = vmax.f32 %v1200_v44, 0.0  ;;  %v2944_v45 = vpop.f32.mrb[52].mxu1  ;;  %v3372_v44 = vld [vmem:[%s4590_s3 + $0x1e4] ss:$8 sps:$4 sm:$0xff]  }
 0x288   :  { %v2945_v56 = vpop.f32.mrb[53].mxu1 }
 0x289   :  { %v2946_v47 = vadd.f32 %v2945_v56, %v2944_v45  ;;  %v2947_v62 = vpop.f32.mrb[54].mxu1  ;;  %v1304_v46 = vpack.c.bf16 %v1252_v22, %v1251_v55  ;;  %v3374_v55 = vld [vmem:[%s4590_s3 + $0x1e0] ss:$8 sps:$4 sm:$0xff]   ;;  %v3375_v22 = vld [vmem:[%s4590_s3 + $0x1f4] ss:$8 sps:$4 sm:$0xff]   ;;  %v4323_v56 = vpop.permute.xlu0 %1423 }
 0x28a   :  { %v2948_v49 = vpop.f32.mrb[55].mxu1  ;;  %v3377_v45 = vld [vmem:[%s4590_s3 + $0x1f0] ss:$8 sps:$4 sm:$0xff]  }
 0x28b   :  { %v1205_v13 = vadd.f32 %v2946_v47, %v4184_v23  ;;  %v2949_v58 = vadd.f32 %v2948_v49, %v2947_v62  ;;  %2970 = vmatprep.subr.bf16.mxu0 %v1304_v46  ;;  %v4325_v47 = vpop.permute.xlu1 %1428 }
 0x28c   :  { %2971 = vmatpush3.bf16.msra.mxu0 %v4192_v48 }
 0x28d   :  { %v1208_v57 = vadd.f32 %v2949_v58, %v4186_v27  ;;  %v1253_v17 = vmax.f32 %v1205_v13, 0.0  ;;  %v1344_v62 = vpop.permute.xlu0 %1343 }
 0x28f   :  { %v1254_v54 = vmax.f32 %v1208_v57, 0.0  ;;  %v2950_v1 = vpop.f32.mrb[56].mxu1  ;;  %v1349_v46 = vpop.permute.xlu1 %1348 }
 0x290   :  { %v2951_v28 = vpop.f32.mrb[57].mxu1 }
 0x291   :  { %v2952_v2 = vadd.f32 %v2951_v28, %v2950_v1  ;;  %v2953_v18 = vpop.f32.mrb[58].mxu1  ;;  %v1305_v37 = vpack.c.bf16 %v1254_v54, %v1253_v17  ;;  %v4327_v49 = vpop.permute.xlu0 %1433 }
 0x292   :  { %v2954_v38 = vpop.f32.mrb[59].mxu1 }
 0x293   :  { %v1213_v21 = vadd.f32 %v2952_v2, %v4190_v16  ;;  %v2955_v11 = vadd.f32 %v2954_v38, %v2953_v18  ;;  %2972 = vmatprep.subr.bf16.mxu0 %v1305_v37  ;;  %v4329_v13 = vpop.permute.xlu1 %1438 }
 0x294   :  { %2973 = vmatpush3.bf16.msra.mxu0 %v4196_v8 }
 0x295   :  { %v1216_v23 = vadd.f32 %v2955_v11, %v4194_v51  ;;  %v1255_v19 = vmax.f32 %v1213_v21, 0.0  ;;  %v3330_v51 = vld [vmem:[%s4590_s3 + $0x100] ss:$8 sps:$4 sm:$0xff]   ;;  %v1354_v58 = vpop.permute.xlu0 %1353 }
 0x297   :  { %v1256_v48 = vmax.f32 %v1216_v23, 0.0  ;;  %v2956_v59 = vpop.f32.mrb[60].mxu1  ;;  %v1359_v57 = vpop.permute.xlu1 %1358 }
 0x298   :  { %v2957_v27 = vpop.f32.mrb[61].mxu1 }
 0x299   :  { %v2958_v61 = vadd.f32 %v2957_v27, %v2956_v59  ;;  %v2959_v5 = vpop.f32.mrb[62].mxu1  ;;  %v1306_v12 = vpack.c.bf16 %v1256_v48, %v1255_v19  ;;  %v4331_v17 = vpop.permute.xlu0 %1443  ;;  %v3380_v48 = vld [vmem:[%s4590_s3 + $0x204] ss:$8 sps:$4 sm:$0xff]  }
 0x29a   :  { %v2960_v63 = vpop.f32.mrb[63].mxu1  ;;  %2288 = vmatprep.mubr.bf16.mxu1 %v3380_v48 }
 0x29b   :  { %v1221_v0 = vadd.f32 %v2958_v61, %v4198_v6  ;;  %v2961_v3 = vadd.f32 %v2960_v63, %v2959_v5  ;;  %2974 = vmatprep.subr.bf16.mxu0 %v1306_v12  ;;  %v3333_v6 = vld [vmem:[%s4590_s3 + $0x114] ss:$8 sps:$4 sm:$0xff]   ;;  %v4333_v54 = vpop.permute.xlu1 %1448 }
 0x29c   :  { %2975 = vmatpush3.bf16.msra.mxu0 %v4202_v4  ;;  %v3336_v4 = vld [vmem:[%s4590_s3 + $0x124] ss:$8 sps:$4 sm:$0xff]  }
 0x29d   :  { %v1224_v16 = vadd.f32 %v2961_v3, %v4200_v10  ;;  %v1257_v7 = vmax.f32 %v1221_v0, 0.0  ;;  %v3335_v10 = vld [vmem:[%s4590_s3 + $0x110] ss:$8 sps:$4 sm:$0xff]   ;;  %v1364_v1 = vpop.permute.xlu0 %1363 }
 0x29f   :  { %v1258_v8 = vmax.f32 %v1224_v16, 0.0  ;;  %v1369_v2 = vpop.permute.xlu1 %1368 }
 0x2a1   :  { %v1307_v20 = vpack.c.bf16 %v1258_v8, %v1257_v7  ;;  %v4335_v19 = vpop.permute.xlu0 %1453 }
 0x2a3   :  { %2976 = vmatprep.subr.bf16.mxu0 %v1307_v20  ;;  %v4340_v27 = vpop.permute.xlu1 %1458 }
 0x2a4   :  { %2977 = vmatpush3.bf16.msra.mxu0 %v4204_v43  ;;  %v3338_v43 = vld [vmem:[%s4590_s3 + $0x120] ss:$8 sps:$4 sm:$0xff]  }
 0x2a5   :  { %v1374_v7 = vpop.permute.xlu0 %1373 }
 0x2a7   :  { %1694 = vmatmul.mubr.bf16.vlgmr.msra.gmra.mrb[32].mxu0 %v3330_v51 }
 0x2a8   :  { %1701 = vmatprep.mubr.bf16.mxu0 %v3333_v6  ;;  %v1379_v6 = vpop.permute.xlu1 %1378 }
 0x2af   :  { %1702 = vmatmul.mubr.bf16.gmra.mrb[36].mxu0 %v3335_v10 }
 0x2b0   :  { %1709 = vmatprep.mubr.bf16.mxu0 %v3336_v4 }
 0x2b7   :  { %1710 = vmatmul.mubr.bf16.gmra.mrb[40].mxu0 %v3338_v43 }
 0x2b8   :  { %1717 = vmatprep.mubr.bf16.mxu0 %v3339_v35 }
 0x2bf   :  { %1718 = vmatmul.mubr.bf16.gmra.mrb[44].mxu0 %v3341_v40  ;;  %v4344_v40 = vpop.permute.xlu0 %1463 }
 0x2c0   :  { %1725 = vmatprep.mubr.bf16.mxu0 %v3342_v52 }
 0x2c7   :  { %1726 = vmatmul.mubr.bf16.gmra.mrb[48].mxu0 %v3344_v14 }
 0x2c8   :  { %1733 = vmatprep.mubr.bf16.mxu0 %v3345_v32 }
 0x2cf   :  { %1734 = vmatmul.mubr.bf16.gmra.mrb[52].mxu0 %v3347_v29 }
 0x2d0   :  { %1741 = vmatprep.mubr.bf16.mxu0 %v3348_v15  ;;  %v4348_v15 = vpop.permute.xlu1 %1468 }
 0x2d7   :  { %1742 = vmatmul.mubr.bf16.gmra.mrb[56].mxu0 %v3350_v9 }
 0x2d8   :  { %1749 = vmatprep.mubr.bf16.mxu0 %v3351_v42 }
 0x2df   :  { %1750 = vmatmul.mubr.bf16.gmra.mrb[60].mxu0 %v3353_v31 }
 0x2e0   :  { %1757 = vmatprep.mubr.bf16.mxu0 %v3354_v30 }
 0x2e7   :  { %1758 = vmatmul.mubr.bf16.gmra.mrb[64].mxu0 %v3356_v36  ;;  %v1384_v36 = vpop.permute.xlu0 %1383 }
 0x2e8   :  { %1765 = vmatprep.mubr.bf16.mxu0 %v3357_v24 }
 0x2ef   :  { %1766 = vmatmul.mubr.bf16.gmra.mrb[68].mxu0 %v3359_v26 }
 0x2f0   :  { %1773 = vmatprep.mubr.bf16.mxu0 %v3360_v33 }
 0x2f7   :  { %1774 = vmatmul.mubr.bf16.gmra.mrb[72].mxu0 %v3362_v34  ;;  %v1389_v34 = vpop.permute.xlu1 %1388 }
 0x2f8   :  { %1781 = vmatprep.mubr.bf16.mxu0 %v3363_v25 }
 0x2ff   :  { %1782 = vmatmul.mubr.bf16.gmra.mrb[76].mxu0 %v3365_v39 }
 0x300   :  { %1789 = vmatprep.mubr.bf16.mxu0 %v3366_v41 }
 0x307   :  { %1790 = vmatmul.mubr.bf16.gmra.mrb[80].mxu0 %v3368_v60 }
 0x308   :  { %1797 = vmatprep.mubr.bf16.mxu0 %v3369_v53 }
 0x30f   :  { %1798 = vmatmul.mubr.bf16.gmra.mrb[84].mxu0 %v3371_v50 }
 0x310   :  { %1805 = vmatprep.mubr.bf16.mxu0 %v3372_v44 }
 0x317   :  { %1806 = vmatmul.mubr.bf16.gmra.mrb[88].mxu0 %v3374_v55  ;;  %v4352_v55 = vpop.permute.xlu0 %1473 }
 0x318   :  { %1813 = vmatprep.mubr.bf16.mxu0 %v3375_v22 }
 0x31f   :  { %1814 = vmatmul.mubr.bf16.gmra.mrb[92].mxu0 %v3377_v45  ;;  %v4354_v45 = vpop.permute.xlu1 %1478 }
 0x37a   :  { %v2978_v28 = vpop.f32.mrb[32].mxu0 }
 0x37b   :  { %v2979_v18 = vpop.f32.mrb[33].mxu0 }
 0x37c   :  { %v2980_v37 = vadd.f32 %v2979_v18, %v2978_v28  ;;  %v2981_v38 = vpop.f32.mrb[34].mxu0  ;;  %v1394_v18 = vpop.permute.xlu0 %1393 }
 0x37d   :  { %v2982_v21 = vpop.f32.mrb[35].mxu0 }
 0x37e   :  { %v1696_v11 = vadd.f32 %v2980_v37, %v1344_v62  ;;  %v2983_v23 = vadd.f32 %v2982_v21, %v2981_v38 }
 0x380   :  { %v1699_v59 = vadd.f32 %v2983_v23, %v1349_v46  ;;  %v1822_v61 = vmax.f32 %v1696_v11, 0.0  ;;  %v1399_v11 = vpop.permute.xlu1 %1398 }
 0x382   :  { %v1823_v5 = vmax.f32 %v1699_v59, 0.0  ;;  %v2984_v12 = vpop.f32.mrb[36].mxu0 }
 0x383   :  { %v2985_v63 = vpop.f32.mrb[37].mxu0 }
 0x384   :  { %v4342_v0 = vpack.c.bf16 %v1823_v5, %v1822_v61  ;;  %v2986_v3 = vadd.f32 %v2985_v63, %v2984_v12  ;;  %v2987_v16 = vpop.f32.mrb[38].mxu0  ;;  %v4358_v5 = vpop.permute.xlu0 %1483 }
 0x385   :  { %v2988_v8 = vpop.f32.mrb[39].mxu0 }
 0x386   :  { %v1704_v20 = vadd.f32 %v2986_v3, %v1354_v58  ;;  %v2989_v51 = vadd.f32 %v2988_v8, %v2987_v16 }
 0x388   :  { %v1707_v10 = vadd.f32 %v2989_v51, %v1359_v57  ;;  %v1824_v4 = vmax.f32 %v1704_v20, 0.0 }
 0x38a   :  { %v1825_v43 = vmax.f32 %v1707_v10, 0.0  ;;  %v2990_v35 = vpop.f32.mrb[40].mxu0  ;;  %v1404_v10 = vpop.permute.xlu0 %1403 }
 0x38b   :  { %v2991_v52 = vpop.f32.mrb[41].mxu0 }
 0x38c   :  { %v4346_v14 = vpack.c.bf16 %v1825_v43, %v1824_v4  ;;  %v2992_v32 = vadd.f32 %v2991_v52, %v2990_v35  ;;  %v2993_v29 = vpop.f32.mrb[42].mxu0 }
 0x38d   :  { %v2994_v9 = vpop.f32.mrb[43].mxu0 }
 0x38e   :  { %v1712_v42 = vadd.f32 %v2992_v32, %v1364_v1  ;;  %v2995_v31 = vadd.f32 %v2994_v9, %v2993_v29 }
 0x390   :  { %v1715_v30 = vadd.f32 %v2995_v31, %v1369_v2  ;;  %v1826_v24 = vmax.f32 %v1712_v42, 0.0 }
 0x392   :  { %v1827_v26 = vmax.f32 %v1715_v30, 0.0  ;;  %v2996_v33 = vpop.f32.mrb[44].mxu0 }
 0x393   :  { %v2997_v25 = vpop.f32.mrb[45].mxu0 }
 0x394   :  { %v4350_v39 = vpack.c.bf16 %v1827_v26, %v1826_v24  ;;  %v2998_v41 = vadd.f32 %v2997_v25, %v2996_v33  ;;  %v2999_v60 = vpop.f32.mrb[46].mxu0  ;;  %v4366_v24 = vpop.permute.xlu0 %1493 }
 0x395   :  { %v3000_v53 = vpop.f32.mrb[47].mxu0 }
 0x396   :  { %v1720_v50 = vadd.f32 %v2998_v41, %v1374_v7  ;;  %v3001_v44 = vadd.f32 %v3000_v53, %v2999_v60  ;;  %v4362_v7 = vpop.permute.xlu1 %1488 }
 0x398   :  { %v1723_v22 = vadd.f32 %v3001_v44, %v1379_v6  ;;  %v1828_v62 = vmax.f32 %v1720_v50, 0.0 }
 0x39a   :  { %v1829_v46 = vmax.f32 %v1723_v22, 0.0  ;;  %v3002_v58 = vpop.f32.mrb[48].mxu0  ;;  %v1409_v52 = vpop.permute.xlu1 %1408 }
 0x39b   :  { %v3003_v57 = vpop.f32.mrb[49].mxu0  ;;  %v1414_v22 = vpop.permute.xlu0 %1413 }
 0x39c   :  { %v4356_v1 = vpack.c.bf16 %v1829_v46, %v1828_v62  ;;  %v3004_v28 = vadd.f32 %v3003_v57, %v3002_v58  ;;  %v3005_v2 = vpop.f32.mrb[50].mxu0 }
 0x39d   :  { %v3006_v37 = vpop.f32.mrb[51].mxu0 }
 0x39e   :  { %v1728_v38 = vadd.f32 %v3004_v28, %v1384_v36  ;;  %v3007_v21 = vadd.f32 %v3006_v37, %v3005_v2  ;;  %v4368_v33 = vpop.permute.xlu1 %1498 }
 0x3a0   :  { %v1731_v23 = vadd.f32 %v3007_v21, %v1389_v34  ;;  %v1830_v48 = vmax.f32 %v1728_v38, 0.0 }
 0x3a2   :  { %v1831_v59 = vmax.f32 %v1731_v23, 0.0  ;;  %v3008_v61 = vpop.f32.mrb[52].mxu0  ;;  %v1419_v57 = vpop.permute.xlu1 %1418 }
 0x3a3   :  { %v3009_v12 = vpop.f32.mrb[53].mxu0 }
 0x3a4   :  { %v4360_v63 = vpack.c.bf16 %v1831_v59, %v1830_v48  ;;  %v3010_v3 = vadd.f32 %v3009_v12, %v3008_v61  ;;  %v3011_v16 = vpop.f32.mrb[54].mxu0 }
 0x3a5   :  { %v3012_v8 = vpop.f32.mrb[55].mxu0 }
 0x3a6   :  { %v1736_v20 = vadd.f32 %v3010_v3, %v1394_v18  ;;  %v3013_v51 = vadd.f32 %v3012_v8, %v3011_v16 }
 0x3a8   :  { %v1739_v6 = vadd.f32 %v3013_v51, %v1399_v11  ;;  %v1832_v4 = vmax.f32 %v1736_v20, 0.0 }
 0x3aa   :  { %v1833_v43 = vmax.f32 %v1739_v6, 0.0  ;;  %v3014_v35 = vpop.f32.mrb[56].mxu0 }
 0x3ab   :  { %v3015_v32 = vpop.f32.mrb[57].mxu0 }
 0x3ac   :  { %v4364_v29 = vpack.c.bf16 %v1833_v43, %v1832_v4  ;;  %v3016_v9 = vadd.f32 %v3015_v32, %v3014_v35  ;;  %v3017_v42 = vpop.f32.mrb[58].mxu0 }
 0x3ad   :  { %v3018_v31 = vpop.f32.mrb[59].mxu0 }
 0x3ae   :  { %v1744_v30 = vadd.f32 %v3016_v9, %v1404_v10  ;;  %v3019_v36 = vadd.f32 %v3018_v31, %v3017_v42 }
 0x3b0   :  { %v1747_v26 = vadd.f32 %v3019_v36, %v1409_v52  ;;  %v1834_v34 = vmax.f32 %v1744_v30, 0.0 }
 0x3b2   :  { %v1835_v25 = vmax.f32 %v1747_v26, 0.0  ;;  %v3020_v41 = vpop.f32.mrb[60].mxu0 }
 0x3b3   :  { %v3021_v60 = vpop.f32.mrb[61].mxu0 }
 0x3b4   :  { %v4370_v53 = vpack.c.bf16 %v1835_v25, %v1834_v34  ;;  %v3022_v50 = vadd.f32 %v3021_v60, %v3020_v41  ;;  %v3023_v44 = vpop.f32.mrb[62].mxu0 }
 0x3b5   :  { %v3024_v62 = vpop.f32.mrb[63].mxu0 }
 0x3b6   :  { %v1752_v46 = vadd.f32 %v3022_v50, %v1414_v22  ;;  %v3025_v58 = vadd.f32 %v3024_v62, %v3023_v44 }
 0x3b8   :  { %v1755_v28 = vadd.f32 %v3025_v58, %v1419_v57  ;;  %v1836_v2 = vmax.f32 %v1752_v46, 0.0 }
 0x3ba   :  { %v1837_v18 = vmax.f32 %v1755_v28, 0.0  ;;  %v3026_v37 = vpop.f32.mrb[64].mxu0 }
 0x3bb   :  { %v3027_v38 = vpop.f32.mrb[65].mxu0 }
 0x3bc   :  { %v4372_v21 = vpack.c.bf16 %v1837_v18, %v1836_v2  ;;  %v3028_v11 = vadd.f32 %v3027_v38, %v3026_v37  ;;  %v3029_v23 = vpop.f32.mrb[66].mxu0 }
 0x3bd   :  { %v3030_v48 = vpop.f32.mrb[67].mxu0 }
 0x3be   :  { %v1760_v59 = vadd.f32 %v3028_v11, %v4323_v56  ;;  %v3031_v61 = vadd.f32 %v3030_v48, %v3029_v23 }
 0x3c0   :  { %v1763_v12 = vadd.f32 %v3031_v61, %v4325_v47  ;;  %v1838_v3 = vmax.f32 %v1760_v59, 0.0 }
 0x3c2   :  { %v1839_v16 = vmax.f32 %v1763_v12, 0.0  ;;  %v3032_v8 = vpop.f32.mrb[68].mxu0 }
 0x3c3   :  { %v3033_v20 = vpop.f32.mrb[69].mxu0 }
 0x3c4   :  { %v3034_v51 = vadd.f32 %v3033_v20, %v3032_v8  ;;  %v3035_v6 = vpop.f32.mrb[70].mxu0  ;;  %v1895_v10 = vpack.c.bf16 %v1839_v16, %v1838_v3 }
 0x3c5   :  { %v3036_v4 = vpop.f32.mrb[71].mxu0 }
 0x3c6   :  { %v1768_v43 = vadd.f32 %v3034_v51, %v4327_v49  ;;  %v3037_v35 = vadd.f32 %v3036_v4, %v3035_v6  ;;  %3074 = vmatprep.subr.bf16.mxu1 %v1895_v10 }
 0x3c7   :  { %3075 = vmatpush3.bf16.msra.mxu1 %v4342_v0 }
 0x3c8   :  { %v1771_v52 = vadd.f32 %v3037_v35, %v4329_v13  ;;  %v1840_v56 = vmax.f32 %v1768_v43, 0.0 }
 0x3ca   :  { %v1841_v32 = vmax.f32 %v1771_v52, 0.0  ;;  %v3038_v9 = vpop.f32.mrb[72].mxu0 }
 0x3cb   :  { %v3039_v47 = vpop.f32.mrb[73].mxu0 }
 0x3cc   :  { %v3040_v42 = vadd.f32 %v3039_v47, %v3038_v9  ;;  %v3041_v31 = vpop.f32.mrb[74].mxu0  ;;  %v1896_v30 = vpack.c.bf16 %v1841_v32, %v1840_v56 }
 0x3cd   :  { %v3042_v36 = vpop.f32.mrb[75].mxu0 }
 0x3ce   :  { %v1776_v26 = vadd.f32 %v3040_v42, %v4331_v17  ;;  %v3043_v34 = vadd.f32 %v3042_v36, %v3041_v31  ;;  %3076 = vmatprep.subr.bf16.mxu1 %v1896_v30 }
 0x3cf   :  { %3077 = vmatpush3.bf16.msra.mxu1 %v4346_v14 }
 0x3d0   :  { %v1779_v49 = vadd.f32 %v3043_v34, %v4333_v54  ;;  %v1842_v25 = vmax.f32 %v1776_v26, 0.0 }
 0x3d2   :  { %v1843_v0 = vmax.f32 %v1779_v49, 0.0  ;;  %v3044_v41 = vpop.f32.mrb[76].mxu0  ;;  %v3387_v49 = vld [vmem:[%s4590_s3 + $0x234] ss:$8 sps:$4 sm:$0xff]  }
 0x3d3   :  { %v3045_v13 = vpop.f32.mrb[77].mxu0 }
 0x3d4   :  { %v3046_v60 = vadd.f32 %v3045_v13, %v3044_v41  ;;  %v3047_v50 = vpop.f32.mrb[78].mxu0  ;;  %v1897_v44 = vpack.c.bf16 %v1843_v0, %v1842_v25  ;;  %v3389_v25 = vld [vmem:[%s4590_s3 + $0x230] ss:$8 sps:$4 sm:$0xff]   ;;  %v3390_v0 = vld [vmem:[%s4590_s3 + $0x244] ss:$8 sps:$4 sm:$0xff]  }
 0x3d5   :  { %v3048_v22 = vpop.f32.mrb[79].mxu0  ;;  %v3392_v41 = vld [vmem:[%s4590_s3 + $0x240] ss:$8 sps:$4 sm:$0xff]   ;;  %v3393_v13 = vld [vmem:[%s4590_s3 + $0x254] ss:$8 sps:$4 sm:$0xff]  }
 0x3d6   :  { %v1784_v62 = vadd.f32 %v3046_v60, %v4335_v19  ;;  %v3049_v46 = vadd.f32 %v3048_v22, %v3047_v50  ;;  %3078 = vmatprep.subr.bf16.mxu1 %v1897_v44  ;;  %v3395_v60 = vld [vmem:[%s4590_s3 + $0x250] ss:$8 sps:$4 sm:$0xff]   ;;  %v3396_v50 = vld [vmem:[%s4590_s3 + $0x264] ss:$8 sps:$4 sm:$0xff]   ;;  %v3398_v44 = vld [vmem:[%s4590_s3 + $0x260] ss:$8 sps:$4 sm:$0xff]  }
 0x3d7   :  { %3079 = vmatpush3.bf16.msra.mxu1 %v4350_v39  ;;  %v3399_v22 = vld [vmem:[%s4590_s3 + $0x274] ss:$8 sps:$4 sm:$0xff]  }
 0x3d8   :  { %v1787_v17 = vadd.f32 %v3049_v46, %v4340_v27  ;;  %v1844_v58 = vmax.f32 %v1784_v62, 0.0  ;;  %v3401_v62 = vld [vmem:[%s4590_s3 + $0x270] ss:$8 sps:$4 sm:$0xff]   ;;  %v3402_v46 = vld [vmem:[%s4590_s3 + $0x284] ss:$8 sps:$4 sm:$0xff]  }
 0x3da   :  { %v1845_v14 = vmax.f32 %v1787_v17, 0.0  ;;  %v3050_v57 = vpop.f32.mrb[80].mxu0  ;;  %v3404_v17 = vld [vmem:[%s4590_s3 + $0x280] ss:$8 sps:$4 sm:$0xff]  }
 0x3db   :  { %v3051_v54 = vpop.f32.mrb[81].mxu0 }
 0x3dc   :  { %v3052_v28 = vadd.f32 %v3051_v54, %v3050_v57  ;;  %v3053_v2 = vpop.f32.mrb[82].mxu0  ;;  %v1898_v18 = vpack.c.bf16 %v1845_v14, %v1844_v58  ;;  %v3405_v58 = vld [vmem:[%s4590_s3 + $0x294] ss:$8 sps:$4 sm:$0xff]   ;;  %v3407_v14 = vld [vmem:[%s4590_s3 + $0x290] ss:$8 sps:$4 sm:$0xff]  }
 0x3dd   :  { %v3054_v37 = vpop.f32.mrb[83].mxu0  ;;  %v3408_v57 = vld [vmem:[%s4590_s3 + $0x2a4] ss:$8 sps:$4 sm:$0xff]   ;;  %v3410_v54 = vld [vmem:[%s4590_s3 + $0x2a0] ss:$8 sps:$4 sm:$0xff]  }
 0x3de   :  { %v1792_v38 = vadd.f32 %v3052_v28, %v4344_v40  ;;  %v3055_v11 = vadd.f32 %v3054_v37, %v3053_v2  ;;  %3080 = vmatprep.subr.bf16.mxu1 %v1898_v18  ;;  %v3411_v28 = vld [vmem:[%s4590_s3 + $0x2b4] ss:$8 sps:$4 sm:$0xff]   ;;  %v3413_v2 = vld [vmem:[%s4590_s3 + $0x2b0] ss:$8 sps:$4 sm:$0xff]   ;;  %v3414_v18 = vld [vmem:[%s4590_s3 + $0x2c4] ss:$8 sps:$4 sm:$0xff]  }
 0x3df   :  { %3081 = vmatpush3.bf16.msra.mxu1 %v4356_v1  ;;  %v3416_v37 = vld [vmem:[%s4590_s3 + $0x2c0] ss:$8 sps:$4 sm:$0xff]  }
 0x3e0   :  { %v1795_v19 = vadd.f32 %v3055_v11, %v4348_v15  ;;  %v1846_v23 = vmax.f32 %v1792_v38, 0.0  ;;  %v3417_v38 = vld [vmem:[%s4590_s3 + $0x2d4] ss:$8 sps:$4 sm:$0xff]   ;;  %v3419_v11 = vld [vmem:[%s4590_s3 + $0x2d0] ss:$8 sps:$4 sm:$0xff]  }
 0x3e2   :  { %v1847_v39 = vmax.f32 %v1795_v19, 0.0  ;;  %v3056_v48 = vpop.f32.mrb[84].mxu0  ;;  %v3420_v19 = vld [vmem:[%s4590_s3 + $0x2e4] ss:$8 sps:$4 sm:$0xff]  }
 0x3e3   :  { %v3057_v27 = vpop.f32.mrb[85].mxu0 }
 0x3e4   :  { %v3058_v59 = vadd.f32 %v3057_v27, %v3056_v48  ;;  %v3059_v61 = vpop.f32.mrb[86].mxu0  ;;  %v1899_v12 = vpack.c.bf16 %v1847_v39, %v1846_v23  ;;  %v3422_v23 = vld [vmem:[%s4590_s3 + $0x2e0] ss:$8 sps:$4 sm:$0xff]   ;;  %v3423_v39 = vld [vmem:[%s4590_s3 + $0x2f4] ss:$8 sps:$4 sm:$0xff]   ;;  %v4491_v27 = vpop.permute.xlu0 %2018 }
 0x3e5   :  { %v3060_v3 = vpop.f32.mrb[87].mxu0  ;;  %v3425_v48 = vld [vmem:[%s4590_s3 + $0x2f0] ss:$8 sps:$4 sm:$0xff]  }
 0x3e6   :  { %v1800_v16 = vadd.f32 %v3058_v59, %v4352_v55  ;;  %v3061_v8 = vadd.f32 %v3060_v3, %v3059_v61  ;;  %3082 = vmatprep.subr.bf16.mxu1 %v1899_v12  ;;  %v4493_v59 = vpop.permute.xlu1 %2023 }
 0x3e7   :  { %3083 = vmatpush3.bf16.msra.mxu1 %v4360_v63 }
 0x3e8   :  { %v1803_v40 = vadd.f32 %v3061_v8, %v4354_v45  ;;  %v1848_v20 = vmax.f32 %v1800_v16, 0.0  ;;  %v1939_v61 = vpop.permute.xlu0 %1938 }
 0x3ea   :  { %v1849_v1 = vmax.f32 %v1803_v40, 0.0  ;;  %v3062_v51 = vpop.f32.mrb[88].mxu0  ;;  %v1944_v12 = vpop.permute.xlu1 %1943 }
 0x3eb   :  { %v3063_v15 = vpop.f32.mrb[89].mxu0 }
 0x3ec   :  { %v3064_v6 = vadd.f32 %v3063_v15, %v3062_v51  ;;  %v3065_v10 = vpop.f32.mrb[90].mxu0  ;;  %v1900_v4 = vpack.c.bf16 %v1849_v1, %v1848_v20  ;;  %v4495_v3 = vpop.permute.xlu0 %2028 }
 0x3ed   :  { %v3066_v43 = vpop.f32.mrb[91].mxu0 }
 0x3ee   :  { %v1808_v35 = vadd.f32 %v3064_v6, %v4358_v5  ;;  %v3067_v52 = vadd.f32 %v3066_v43, %v3065_v10  ;;  %3084 = vmatprep.subr.bf16.mxu1 %v1900_v4  ;;  %v4497_v16 = vpop.permute.xlu1 %2033 }
 0x3ef   :  { %3085 = vmatpush3.bf16.msra.mxu1 %v4364_v29 }
 0x3f0   :  { %v1811_v55 = vadd.f32 %v3067_v52, %v4362_v7  ;;  %v1850_v56 = vmax.f32 %v1808_v35, 0.0  ;;  %v3378_v7 = vld [vmem:[%s4590_s3 + $0x200] ss:$8 sps:$4 sm:$0xff]   ;;  %v1949_v8 = vpop.permute.xlu0 %1948 }
 0x3f2   :  { %v1851_v63 = vmax.f32 %v1811_v55, 0.0  ;;  %v3068_v32 = vpop.f32.mrb[92].mxu0  ;;  %v1954_v40 = vpop.permute.xlu1 %1953 }
 0x3f3   :  { %v3069_v45 = vpop.f32.mrb[93].mxu0 }
 0x3f4   :  { %v3070_v9 = vadd.f32 %v3069_v45, %v3068_v32  ;;  %v3071_v47 = vpop.f32.mrb[94].mxu0  ;;  %v1901_v42 = vpack.c.bf16 %v1851_v63, %v1850_v56  ;;  %v4499_v20 = vpop.permute.xlu0 %2038  ;;  %v3428_v63 = vld [vmem:[%s4592_s5 + $0x4] ss:$8 sps:$4 sm:$0xff]  }
 0x3f5   :  { %v3072_v31 = vpop.f32.mrb[95].mxu0  ;;  %2545 = vmatprep.mubr.bf16.mxu0 %v3428_v63 }
 0x3f6   :  { %v1816_v30 = vadd.f32 %v3070_v9, %v4366_v24  ;;  %v3073_v36 = vadd.f32 %v3072_v31, %v3071_v47  ;;  %3086 = vmatprep.subr.bf16.mxu1 %v1901_v42  ;;  %v3381_v24 = vld [vmem:[%s4590_s3 + $0x214] ss:$8 sps:$4 sm:$0xff]   ;;  %v4501_v1 = vpop.permute.xlu1 %2043 }
 0x3f7   :  { %3087 = vmatpush3.bf16.msra.mxu1 %v4370_v53  ;;  %v3384_v53 = vld [vmem:[%s4590_s3 + $0x224] ss:$8 sps:$4 sm:$0xff]  }
 0x3f8   :  { %v1819_v5 = vadd.f32 %v3073_v36, %v4368_v33  ;;  %v1852_v26 = vmax.f32 %v1816_v30, 0.0  ;;  %v3383_v33 = vld [vmem:[%s4590_s3 + $0x210] ss:$8 sps:$4 sm:$0xff]   ;;  %v1959_v51 = vpop.permute.xlu0 %1958 }
 0x3fa   :  { %v1853_v29 = vmax.f32 %v1819_v5, 0.0  ;;  %v1964_v6 = vpop.permute.xlu1 %1963 }
 0x3fc   :  { %v1902_v34 = vpack.c.bf16 %v1853_v29, %v1852_v26  ;;  %v4503_v56 = vpop.permute.xlu0 %2048 }
 0x3fe   :  { %3088 = vmatprep.subr.bf16.mxu1 %v1902_v34  ;;  %v4508_v45 = vpop.permute.xlu1 %2053 }
 0x3ff   :  { %3089 = vmatpush3.bf16.msra.mxu1 %v4372_v21  ;;  %v3386_v21 = vld [vmem:[%s4590_s3 + $0x220] ss:$8 sps:$4 sm:$0xff]  }
 0x400   :  { %v1969_v26 = vpop.permute.xlu0 %1968 }
 0x402   :  { %2289 = vmatmul.mubr.bf16.vlgmr.msra.gmra.mrb[64].mxu1 %v3378_v7 }
 0x403   :  { %2296 = vmatprep.mubr.bf16.mxu1 %v3381_v24  ;;  %v1974_v24 = vpop.permute.xlu1 %1973 }
 0x40a   :  { %2297 = vmatmul.mubr.bf16.gmra.mrb[68].mxu1 %v3383_v33 }
 0x40b   :  { %2304 = vmatprep.mubr.bf16.mxu1 %v3384_v53 }
 0x412   :  { %2305 = vmatmul.mubr.bf16.gmra.mrb[72].mxu1 %v3386_v21 }
 0x413   :  { %2312 = vmatprep.mubr.bf16.mxu1 %v3387_v49 }
 0x41a   :  { %2313 = vmatmul.mubr.bf16.gmra.mrb[76].mxu1 %v3389_v25  ;;  %v4512_v25 = vpop.permute.xlu0 %2058 }
 0x41b   :  { %2320 = vmatprep.mubr.bf16.mxu1 %v3390_v0 }
 0x422   :  { %2321 = vmatmul.mubr.bf16.gmra.mrb[80].mxu1 %v3392_v41 }
 0x423   :  { %2328 = vmatprep.mubr.bf16.mxu1 %v3393_v13 }
 0x42a   :  { %2329 = vmatmul.mubr.bf16.gmra.mrb[84].mxu1 %v3395_v60 }
 0x42b   :  { %2336 = vmatprep.mubr.bf16.mxu1 %v3396_v50  ;;  %v4516_v50 = vpop.permute.xlu1 %2063 }
 0x432   :  { %2337 = vmatmul.mubr.bf16.gmra.mrb[88].mxu1 %v3398_v44 }
 0x433   :  { %2344 = vmatprep.mubr.bf16.mxu1 %v3399_v22 }
 0x43a   :  { %2345 = vmatmul.mubr.bf16.gmra.mrb[92].mxu1 %v3401_v62 }
 0x43b   :  { %2352 = vmatprep.mubr.bf16.mxu1 %v3402_v46 }
 0x442   :  { %2353 = vmatmul.mubr.bf16.gmra.mrb[96].mxu1 %v3404_v17  ;;  %v1979_v17 = vpop.permute.xlu0 %1978 }
 0x443   :  { %2360 = vmatprep.mubr.bf16.mxu1 %v3405_v58 }
 0x44a   :  { %2361 = vmatmul.mubr.bf16.gmra.mrb[100].mxu1 %v3407_v14 }
 0x44b   :  { %2368 = vmatprep.mubr.bf16.mxu1 %v3408_v57 }
 0x452   :  { %2369 = vmatmul.mubr.bf16.gmra.mrb[104].mxu1 %v3410_v54  ;;  %v1984_v54 = vpop.permute.xlu1 %1983 }
 0x453   :  { %2376 = vmatprep.mubr.bf16.mxu1 %v3411_v28 }
 0x45a   :  { %2377 = vmatmul.mubr.bf16.gmra.mrb[108].mxu1 %v3413_v2 }
 0x45b   :  { %2384 = vmatprep.mubr.bf16.mxu1 %v3414_v18 }
 0x462   :  { %2385 = vmatmul.mubr.bf16.gmra.mrb[112].mxu1 %v3416_v37 }
 0x463   :  { %2392 = vmatprep.mubr.bf16.mxu1 %v3417_v38 }
 0x46a   :  { %2393 = vmatmul.mubr.bf16.gmra.mrb[116].mxu1 %v3419_v11 }
 0x46b   :  { %2400 = vmatprep.mubr.bf16.mxu1 %v3420_v19 }
 0x472   :  { %2401 = vmatmul.mubr.bf16.gmra.mrb[120].mxu1 %v3422_v23  ;;  %v4520_v23 = vpop.permute.xlu0 %2068 }
 0x473   :  { %2408 = vmatprep.mubr.bf16.mxu1 %v3423_v39 }
 0x47a   :  { %2409 = vmatmul.mubr.bf16.gmra.mrb[124].mxu1 %v3425_v48  ;;  %v4522_v48 = vpop.permute.xlu1 %2073 }
 0x4d5   :  { %v3090_v15 = vpop.f32.mrb[64].mxu1 }
 0x4d6   :  { %v3091_v10 = vpop.f32.mrb[65].mxu1 }
 0x4d7   :  { %v3092_v4 = vadd.f32 %v3091_v10, %v3090_v15  ;;  %v3093_v43 = vpop.f32.mrb[66].mxu1  ;;  %v1989_v10 = vpop.permute.xlu0 %1988 }
 0x4d8   :  { %v3094_v35 = vpop.f32.mrb[67].mxu1 }
 0x4d9   :  { %v2291_v52 = vadd.f32 %v3092_v4, %v1939_v61  ;;  %v3095_v55 = vadd.f32 %v3094_v35, %v3093_v43 }
 0x4db   :  { %v2294_v32 = vadd.f32 %v3095_v55, %v1944_v12  ;;  %v2417_v9 = vmax.f32 %v2291_v52, 0.0  ;;  %v1994_v52 = vpop.permute.xlu1 %1993 }
 0x4dd   :  { %v2418_v47 = vmax.f32 %v2294_v32, 0.0  ;;  %v3096_v42 = vpop.f32.mrb[68].mxu1 }
 0x4de   :  { %v3097_v31 = vpop.f32.mrb[69].mxu1 }
 0x4df   :  { %v4510_v30 = vpack.c.bf16 %v2418_v47, %v2417_v9  ;;  %v3098_v36 = vadd.f32 %v3097_v31, %v3096_v42  ;;  %v3099_v5 = vpop.f32.mrb[70].mxu1  ;;  %v4526_v47 = vpop.permute.xlu0 %2078 }
 0x4e0   :  { %v3100_v29 = vpop.f32.mrb[71].mxu1 }
 0x4e1   :  { %v2299_v34 = vadd.f32 %v3098_v36, %v1949_v8  ;;  %v3101_v7 = vadd.f32 %v3100_v29, %v3099_v5 }
 0x4e3   :  { %v2302_v33 = vadd.f32 %v3101_v7, %v1954_v40  ;;  %v2419_v53 = vmax.f32 %v2299_v34, 0.0 }
 0x4e5   :  { %v2420_v21 = vmax.f32 %v2302_v33, 0.0  ;;  %v3102_v49 = vpop.f32.mrb[72].mxu1  ;;  %v1999_v33 = vpop.permute.xlu0 %1998 }
 0x4e6   :  { %v3103_v0 = vpop.f32.mrb[73].mxu1 }
 0x4e7   :  { %v4514_v41 = vpack.c.bf16 %v2420_v21, %v2419_v53  ;;  %v3104_v13 = vadd.f32 %v3103_v0, %v3102_v49  ;;  %v3105_v60 = vpop.f32.mrb[74].mxu1 }
 0x4e8   :  { %v3106_v44 = vpop.f32.mrb[75].mxu1 }
 0x4e9   :  { %v2307_v22 = vadd.f32 %v3104_v13, %v1959_v51  ;;  %v3107_v62 = vadd.f32 %v3106_v44, %v3105_v60 }
 0x4eb   :  { %v2310_v46 = vadd.f32 %v3107_v62, %v1964_v6  ;;  %v2421_v58 = vmax.f32 %v2307_v22, 0.0 }
 0x4ed   :  { %v2422_v14 = vmax.f32 %v2310_v46, 0.0  ;;  %v3108_v57 = vpop.f32.mrb[76].mxu1 }
 0x4ee   :  { %v3109_v28 = vpop.f32.mrb[77].mxu1 }
 0x4ef   :  { %v4518_v2 = vpack.c.bf16 %v2422_v14, %v2421_v58  ;;  %v3110_v18 = vadd.f32 %v3109_v28, %v3108_v57  ;;  %v3111_v37 = vpop.f32.mrb[78].mxu1  ;;  %v4534_v58 = vpop.permute.xlu0 %2088 }
 0x4f0   :  { %v3112_v38 = vpop.f32.mrb[79].mxu1 }
 0x4f1   :  { %v2315_v11 = vadd.f32 %v3110_v18, %v1969_v26  ;;  %v3113_v19 = vadd.f32 %v3112_v38, %v3111_v37  ;;  %v4530_v26 = vpop.permute.xlu1 %2083 }
 0x4f3   :  { %v2318_v39 = vadd.f32 %v3113_v19, %v1974_v24  ;;  %v2423_v61 = vmax.f32 %v2315_v11, 0.0 }
 0x4f5   :  { %v2424_v12 = vmax.f32 %v2318_v39, 0.0  ;;  %v3114_v8 = vpop.f32.mrb[80].mxu1  ;;  %v2004_v0 = vpop.permute.xlu1 %2003 }
 0x4f6   :  { %v3115_v40 = vpop.f32.mrb[81].mxu1  ;;  %v2009_v39 = vpop.permute.xlu0 %2008 }
 0x4f7   :  { %v4524_v51 = vpack.c.bf16 %v2424_v12, %v2423_v61  ;;  %v3116_v15 = vadd.f32 %v3115_v40, %v3114_v8  ;;  %v3117_v6 = vpop.f32.mrb[82].mxu1 }
 0x4f8   :  { %v3118_v4 = vpop.f32.mrb[83].mxu1 }
 0x4f9   :  { %v2323_v43 = vadd.f32 %v3116_v15, %v1979_v17  ;;  %v3119_v35 = vadd.f32 %v3118_v4, %v3117_v6  ;;  %v4536_v57 = vpop.permute.xlu1 %2093 }
 0x4fb   :  { %v2326_v55 = vadd.f32 %v3119_v35, %v1984_v54  ;;  %v2425_v63 = vmax.f32 %v2323_v43, 0.0 }
 0x4fd   :  { %v2426_v32 = vmax.f32 %v2326_v55, 0.0  ;;  %v3120_v9 = vpop.f32.mrb[84].mxu1  ;;  %v2014_v40 = vpop.permute.xlu1 %2013 }
 0x4fe   :  { %v3121_v42 = vpop.f32.mrb[85].mxu1 }
 0x4ff   :  { %v4528_v31 = vpack.c.bf16 %v2426_v32, %v2425_v63  ;;  %v3122_v36 = vadd.f32 %v3121_v42, %v3120_v9  ;;  %v3123_v5 = vpop.f32.mrb[86].mxu1 }
 0x500   :  { %v3124_v29 = vpop.f32.mrb[87].mxu1 }
 0x501   :  { %v2331_v34 = vadd.f32 %v3122_v36, %v1989_v10  ;;  %v3125_v7 = vadd.f32 %v3124_v29, %v3123_v5 }
 0x503   :  { %v2334_v24 = vadd.f32 %v3125_v7, %v1994_v52  ;;  %v2427_v53 = vmax.f32 %v2331_v34, 0.0 }
 0x505   :  { %v2428_v21 = vmax.f32 %v2334_v24, 0.0  ;;  %v3126_v49 = vpop.f32.mrb[88].mxu1 }
 0x506   :  { %v3127_v13 = vpop.f32.mrb[89].mxu1 }
 0x507   :  { %v4532_v60 = vpack.c.bf16 %v2428_v21, %v2427_v53  ;;  %v3128_v44 = vadd.f32 %v3127_v13, %v3126_v49  ;;  %v3129_v22 = vpop.f32.mrb[90].mxu1 }
 0x508   :  { %v3130_v62 = vpop.f32.mrb[91].mxu1 }
 0x509   :  { %v2339_v46 = vadd.f32 %v3128_v44, %v1999_v33  ;;  %v3131_v17 = vadd.f32 %v3130_v62, %v3129_v22 }
 0x50b   :  { %v2342_v14 = vadd.f32 %v3131_v17, %v2004_v0  ;;  %v2429_v54 = vmax.f32 %v2339_v46, 0.0 }
 0x50d   :  { %v2430_v28 = vmax.f32 %v2342_v14, 0.0  ;;  %v3132_v18 = vpop.f32.mrb[92].mxu1 }
 0x50e   :  { %v3133_v37 = vpop.f32.mrb[93].mxu1 }
 0x50f   :  { %v4538_v38 = vpack.c.bf16 %v2430_v28, %v2429_v54  ;;  %v3134_v11 = vadd.f32 %v3133_v37, %v3132_v18  ;;  %v3135_v19 = vpop.f32.mrb[94].mxu1 }
 0x510   :  { %v3136_v61 = vpop.f32.mrb[95].mxu1 }
 0x511   :  { %v2347_v12 = vadd.f32 %v3134_v11, %v2009_v39  ;;  %v3137_v8 = vadd.f32 %v3136_v61, %v3135_v19 }
 0x513   :  { %v2350_v15 = vadd.f32 %v3137_v8, %v2014_v40  ;;  %v2431_v6 = vmax.f32 %v2347_v12, 0.0 }
 0x515   :  { %v2432_v10 = vmax.f32 %v2350_v15, 0.0  ;;  %v3138_v4 = vpop.f32.mrb[96].mxu1 }
 0x516   :  { %v3139_v43 = vpop.f32.mrb[97].mxu1 }
 0x517   :  { %v4540_v35 = vpack.c.bf16 %v2432_v10, %v2431_v6  ;;  %v3140_v52 = vadd.f32 %v3139_v43, %v3138_v4  ;;  %v3141_v55 = vpop.f32.mrb[98].mxu1 }
 0x518   :  { %v3142_v63 = vpop.f32.mrb[99].mxu1 }
 0x519   :  { %v2355_v32 = vadd.f32 %v3140_v52, %v4491_v27  ;;  %v3143_v9 = vadd.f32 %v3142_v63, %v3141_v55 }
 0x51b   :  { %v2358_v42 = vadd.f32 %v3143_v9, %v4493_v59  ;;  %v2433_v36 = vmax.f32 %v2355_v32, 0.0 }
 0x51d   :  { %v2434_v5 = vmax.f32 %v2358_v42, 0.0  ;;  %v3144_v29 = vpop.f32.mrb[100].mxu1 }
 0x51e   :  { %v3145_v34 = vpop.f32.mrb[101].mxu1 }
 0x51f   :  { %v3146_v7 = vadd.f32 %v3145_v34, %v3144_v29  ;;  %v3147_v24 = vpop.f32.mrb[102].mxu1  ;;  %v2461_v33 = vpack.c.bf16 %v2434_v5, %v2433_v36 }
 0x520   :  { %v3148_v53 = vpop.f32.mrb[103].mxu1 }
 0x521   :  { %v2363_v21 = vadd.f32 %v3146_v7, %v4495_v3  ;;  %v3149_v49 = vadd.f32 %v3148_v53, %v3147_v24  ;;  %3186 = vmatprep.subr.bf16.mxu0 %v2461_v33 }
 0x522   :  { %3187 = vmatpush3.bf16.msra.mxu0 %v4510_v30 }
 0x523   :  { %v2366_v0 = vadd.f32 %v3149_v49, %v4497_v16  ;;  %v2435_v27 = vmax.f32 %v2363_v21, 0.0 }
 0x525   :  { %v2436_v13 = vmax.f32 %v2366_v0, 0.0  ;;  %v3150_v44 = vpop.f32.mrb[104].mxu1 }
 0x526   :  { %v3151_v59 = vpop.f32.mrb[105].mxu1 }
 0x527   :  { %v3152_v22 = vadd.f32 %v3151_v59, %v3150_v44  ;;  %v3153_v62 = vpop.f32.mrb[106].mxu1  ;;  %v2462_v46 = vpack.c.bf16 %v2436_v13, %v2435_v27 }
 0x528   :  { %v3154_v17 = vpop.f32.mrb[107].mxu1 }
 0x529   :  { %v2371_v14 = vadd.f32 %v3152_v22, %v4499_v20  ;;  %v3155_v54 = vadd.f32 %v3154_v17, %v3153_v62  ;;  %3188 = vmatprep.subr.bf16.mxu0 %v2462_v46 }
 0x52a   :  { %3189 = vmatpush3.bf16.msra.mxu0 %v4514_v41 }
 0x52b   :  { %v2374_v3 = vadd.f32 %v3155_v54, %v4501_v1  ;;  %v2437_v28 = vmax.f32 %v2371_v14, 0.0 }
 0x52d   :  { %v2438_v30 = vmax.f32 %v2374_v3, 0.0  ;;  %v3156_v18 = vpop.f32.mrb[108].mxu1 }
 0x52e   :  { %v3157_v16 = vpop.f32.mrb[109].mxu1 }
 0x52f   :  { %v3158_v37 = vadd.f32 %v3157_v16, %v3156_v18  ;;  %v3159_v11 = vpop.f32.mrb[110].mxu1  ;;  %v2463_v19 = vpack.c.bf16 %v2438_v30, %v2437_v28  ;;  %v2476_v18 = vpop.permute.xlu0 %2475 }
 0x530   :  { %v3160_v39 = vpop.f32.mrb[111].mxu1 }
 0x531   :  { %v2379_v61 = vadd.f32 %v3158_v37, %v4503_v56  ;;  %v3161_v12 = vadd.f32 %v3160_v39, %v3159_v11  ;;  %3190 = vmatprep.subr.bf16.mxu0 %v2463_v19 }
 0x532   :  { %3191 = vmatpush3.bf16.msra.mxu0 %v4518_v2 }
 0x533   :  { %v2382_v20 = vadd.f32 %v3161_v12, %v4508_v45  ;;  %v2439_v8 = vmax.f32 %v2379_v61, 0.0 }
 0x535   :  { %v2440_v41 = vmax.f32 %v2382_v20, 0.0  ;;  %v3162_v40 = vpop.f32.mrb[112].mxu1 }
 0x536   :  { %v3163_v1 = vpop.f32.mrb[113].mxu1 }
 0x537   :  { %v3164_v15 = vadd.f32 %v3163_v1, %v3162_v40  ;;  %v3165_v6 = vpop.f32.mrb[114].mxu1  ;;  %v2464_v10 = vpack.c.bf16 %v2440_v41, %v2439_v8  ;;  %v2486_v8 = vpop.permute.xlu0 %2485 }
 0x538   :  { %v3166_v4 = vpop.f32.mrb[115].mxu1 }
 0x539   :  { %v2387_v43 = vadd.f32 %v3164_v15, %v4512_v25  ;;  %v3167_v52 = vadd.f32 %v3166_v4, %v3165_v6  ;;  %3192 = vmatprep.subr.bf16.mxu0 %v2464_v10 }
 0x53a   :  { %3193 = vmatpush3.bf16.msra.mxu0 %v4524_v51 }
 0x53b   :  { %v2390_v56 = vadd.f32 %v3167_v52, %v4516_v50  ;;  %v2441_v55 = vmax.f32 %v2387_v43, 0.0 }
 0x53d   :  { %v2442_v2 = vmax.f32 %v2390_v56, 0.0  ;;  %v3168_v63 = vpop.f32.mrb[116].mxu1 }
 0x53e   :  { %v3169_v45 = vpop.f32.mrb[117].mxu1 }
 0x53f   :  { %v3170_v32 = vadd.f32 %v3169_v45, %v3168_v63  ;;  %v3171_v9 = vpop.f32.mrb[118].mxu1  ;;  %v2465_v42 = vpack.c.bf16 %v2442_v2, %v2441_v55 }
 0x540   :  { %v3172_v36 = vpop.f32.mrb[119].mxu1 }
 0x541   :  { %v2395_v5 = vadd.f32 %v3170_v32, %v4520_v23  ;;  %v3173_v29 = vadd.f32 %v3172_v36, %v3171_v9  ;;  %3194 = vmatprep.subr.bf16.mxu0 %v2465_v42 }
 0x542   :  { %3195 = vmatpush3.bf16.msra.mxu0 %v4528_v31 }
 0x543   :  { %v2398_v25 = vadd.f32 %v3173_v29, %v4522_v48  ;;  %v2443_v34 = vmax.f32 %v2395_v5, 0.0 }
 0x545   :  { %v2444_v51 = vmax.f32 %v2398_v25, 0.0  ;;  %v3174_v7 = vpop.f32.mrb[120].mxu1 }
 0x546   :  { %v3175_v50 = vpop.f32.mrb[121].mxu1 }
 0x547   :  { %v3176_v24 = vadd.f32 %v3175_v50, %v3174_v7  ;;  %v3177_v33 = vpop.f32.mrb[122].mxu1  ;;  %v2466_v53 = vpack.c.bf16 %v2444_v51, %v2443_v34 }
 0x548   :  { %v3178_v21 = vpop.f32.mrb[123].mxu1 }
 0x549   :  { %v2403_v49 = vadd.f32 %v3176_v24, %v4526_v47  ;;  %v3179_v0 = vadd.f32 %v3178_v21, %v3177_v33  ;;  %3196 = vmatprep.subr.bf16.mxu0 %v2466_v53 }
 0x54a   :  { %3197 = vmatpush3.bf16.msra.mxu0 %v4532_v60 }
 0x54b   :  { %v2406_v23 = vadd.f32 %v3179_v0, %v4530_v26  ;;  %v2445_v27 = vmax.f32 %v2403_v49, 0.0  ;;  %v3426_v26 = vld [vmem:[%s4592_s5] ss:$8 sps:$4 sm:$0xff]  }
 0x54d   :  { %v2446_v31 = vmax.f32 %v2406_v23, 0.0  ;;  %v3180_v13 = vpop.f32.mrb[124].mxu1 }
 0x54e   :  { %v3181_v48 = vpop.f32.mrb[125].mxu1 }
 0x54f   :  { %v3182_v44 = vadd.f32 %v3181_v48, %v3180_v13  ;;  %v3183_v59 = vpop.f32.mrb[126].mxu1  ;;  %v2467_v22 = vpack.c.bf16 %v2446_v31, %v2445_v27 }
 0x550   :  { %v3184_v62 = vpop.f32.mrb[127].mxu1 }
 0x551   :  { %v2411_v46 = vadd.f32 %v3182_v44, %v4534_v58  ;;  %v3185_v17 = vadd.f32 %v3184_v62, %v3183_v59  ;;  %3198 = vmatprep.subr.bf16.mxu0 %v2467_v22  ;;  %v3429_v58 = vld [vmem:[%s4592_s5 + $0x14] ss:$8 sps:$4 sm:$0xff]  }
 0x552   :  { %3199 = vmatpush3.bf16.msra.mxu0 %v4538_v38 }
 0x553   :  { %v2414_v47 = vadd.f32 %v3185_v17, %v4536_v57  ;;  %v2447_v14 = vmax.f32 %v2411_v46, 0.0  ;;  %v3431_v57 = vld [vmem:[%s4592_s5 + $0x10] ss:$8 sps:$4 sm:$0xff]  }
 0x555   :  { %v2448_v60 = vmax.f32 %v2414_v47, 0.0 }
 0x557   :  { %v2468_v54 = vpack.c.bf16 %v2448_v60, %v2447_v14 }
 0x559   :  { %3200 = vmatprep.subr.bf16.mxu0 %v2468_v54 }
 0x55a   :  { %3201 = vmatpush3.bf16.msra.mxu0 %v4540_v35  ;;  %v2481_v35 = vpop.permute.xlu1 %2480 }
 0x55d   :  { %2546 = vmatmul.mubr.bf16.vlgmr.msra.gmra.mrb[96].mxu0 %v3426_v26 }
 0x55e   :  { %2553 = vmatprep.mubr.bf16.mxu0 %v3429_v58  ;;  %v2491_v15 = vpop.permute.xlu1 %2490 }
 0x565   :  { %2554 = vmatmul.mubr.bf16.gmra.mrb[100].mxu0 %v3431_v57 }
 0x630   :  { %v3202_v38 = vpop.f32.mrb[96].mxu0 }
 0x631   :  { %v3203_v3 = vpop.f32.mrb[97].mxu0 }
 0x632   :  { %v3204_v28 = vadd.f32 %v3203_v3, %v3202_v38  ;;  %v3205_v30 = vpop.f32.mrb[98].mxu0 }
 0x633   :  { %v3206_v16 = vpop.f32.mrb[99].mxu0 }
 0x634   :  { %v2548_v37 = vadd.f32 %v3204_v28, %v2476_v18  ;;  %v3207_v11 = vadd.f32 %v3206_v16, %v3205_v30 }
 0x636   :  { %2562 = vst [vmem:[%s4594_s7] sm:$0xff] %v2548_v37  ;;  %v2551_v19 = vadd.f32 %v3207_v11, %v2481_v35 }
 0x638   :  { %2563 = vst [vmem:[%s4594_s7 + $0x8] sm:$0xff] %v2551_v19  ;;  %v3208_v39 = vpop.f32.mrb[100].mxu0 }
 0x639   :  { %v3209_v61 = vpop.f32.mrb[101].mxu0 }
 0x63a   :  { %v3210_v12 = vadd.f32 %v3209_v61, %v3208_v39  ;;  %v3211_v20 = vpop.f32.mrb[102].mxu0 }
 0x63b   :  { %v3212_v41 = vpop.f32.mrb[103].mxu0 }
 0x63c   :  { %v2556_v40 = vadd.f32 %v3210_v12, %v2486_v8  ;;  %v3213_v1 = vadd.f32 %v3212_v41, %v3211_v20 }
 0x63e   :  { %2564 = vst [vmem:[%s4594_s7 + $0x10] sm:$0xff] %v2556_v40  ;;  %v2559_v6 = vadd.f32 %v3213_v1, %v2491_v15 }
 0x640   :  { %2565 = vst [vmem:[%s4594_s7 + $0x18] sm:$0xff] %v2559_v6 }

</bundles_post_ra>
